<compile_context>
chip_gen: v7x
topology: tpu7x:2x2x1
jax: 0.10.0
libtpu: 0.0.40
codegen_flags: <defaults>
</compile_context>

<pallas_src>
import numpy as np
import jax
import jax.numpy as jnp
from jax.experimental import pallas as pl
from jax.experimental.pallas import tpu as pltpu

MAXC = 8   # max number of skip-word cell inputs merged at one position (padded)
MAXW = 8   # max number of matched words starting at one position (padded)


# ----------------------------------------------------------------------------
# Fused kernel: one grid step == one timestep of the lattice recurrence.
# ----------------------------------------------------------------------------
def _lattice_kernel(cnum_ref, nw_ref, dep_t_ref, dep_slot_ref,       # SMEM scalar prefetch
                    wi_ref, awi_ref, wwi_ref, h0_ref, c0_ref,        # streamed / small VMEM
                    whh_ref, awhh_ref, wwhh_ref,                     # resident weights
                    h_out_ref, c_out_ref,                            # per-step outputs
                    hx_sc, cx_sc, dep_sc):                           # VMEM carries
    H = whh_ref.shape[0]
    t = pl.program_id(0)

    @pl.when(t == 0)
    def _init():
        hx_sc[...] = h0_ref[...]
        cx_sc[...] = c0_ref[...]
        dep_sc[...] = jnp.zeros_like(dep_sc)

    h_prev = hx_sc[...]                       # (1, H)
    c_prev = cx_sc[...]                       # (1, H)
    cnum = cnum_ref[t]                        # # skip-word cells arriving at t

    # ---- MultiInputLSTMCell (char cell); x-projection was hoisted into wi_ref ----
    gates = wi_ref[0] + jnp.dot(h_prev, whh_ref[...],
                                preferred_element_type=jnp.float32)  # (1, 3H)
    i = jax.nn.sigmoid(gates[:, 0:H])
    o = jax.nn.sigmoid(gates[:, H:2 * H])
    g = jnp.tanh(gates[:, 2 * H:3 * H])

    # common path (cnum == 0): coupled forget gate
    cx_sc[...] = (1.0 - i) * c_prev + i * g

    # merge path: only executed when skip-word cells arrive at this position
    @pl.when(cnum > 0)
    def _merge():
        cbuf = dep_sc[t]                                              # (MAXC, H)
        alpha_wh = jnp.dot(cbuf, awhh_ref[...],
                           preferred_element_type=jnp.float32)        # (MAXC, H)
        alpha = jax.nn.sigmoid(awi_ref[0] + alpha_wh)                 # (MAXC, H)
        row = jax.lax.broadcasted_iota(jnp.int32, (MAXC, H), 0)
        valid = row < cnum                                            # mask padded rows
        e_i = jnp.exp(i)                                              # (1, H)
        e_a = jnp.where(valid, jnp.exp(alpha), 0.0)                   # (MAXC, H)
        inv = pl.reciprocal(e_i + jnp.sum(e_a, axis=0, keepdims=True),
                            approx=True)                              # EUP, not VALU
        cbuf_m = jnp.where(valid, cbuf, 0.0)
        cx_sc[...] = (e_i * inv) * g + jnp.sum((e_a * inv) * cbuf_m,
                                               axis=0, keepdims=True)

    c1 = cx_sc[...]
    h1 = o * jnp.tanh(c1)
    hx_sc[...] = h1
    h_out_ref[...] = h1[None]                 # (1, 1, H)
    c_out_ref[...] = c1[None]

    # ---- WordLSTMCell for matched words starting at t; deposit ct rows into the
    #      lattice scratch at their end positions via scalar-prefetched indices ----
    nw = nw_ref[t]

    @pl.when(nw > 0)
    def _words():
        wgates = wwi_ref[0] + jnp.dot(h1, wwhh_ref[...],
                                      preferred_element_type=jnp.float32)  # (MAXW, 3H)
        f_w = jax.nn.sigmoid(wgates[:, 0:H])
        i_w = jax.nn.sigmoid(wgates[:, H:2 * H])
        g_w = jnp.tanh(wgates[:, 2 * H:3 * H])
        ct = f_w * c1 + i_w * g_w                                     # (MAXW, H)

        slot_iota = jax.lax.broadcasted_iota(jnp.int32, (MAXC, H), 0)
        for w in range(MAXW):                                         # static unroll
            @pl.when(w < nw)
            def _deposit(w=w):
                tgt = dep_t_ref[t * MAXW + w]
                slot = dep_slot_ref[t * MAXW + w]
                sel = slot_iota == slot
                dep_sc[tgt] = jnp.where(sel, ct[w:w + 1, :], dep_sc[tgt])


# ----------------------------------------------------------------------------
# index maps (scalar-prefetch refs arrive as trailing positional args)
# ----------------------------------------------------------------------------
def _step_map(t, cnum, nw, dep_t, dep_slot):
    return (t, 0, 0)


def _const_map2(t, cnum, nw, dep_t, dep_slot):
    return (0, 0)


# ----------------------------------------------------------------------------
# jitted wrapper: hoisted projections + the fused pallas_call
# ----------------------------------------------------------------------------
@jax.jit
def _lattice_forward_jit(params, x_seq, word_ids, cnum, nwords, dep_t, dep_slot,
                         h0, c0):
    seq_len = x_seq.shape[0]
    H = params['rnn_whh'].shape[0]

    # Hoisted input projections (one well-shaped matmul each, outside the recurrence).
    wi_seq = (jnp.dot(x_seq, params['rnn_wih'], preferred_element_type=jnp.float32)
              + params['rnn_bias']).reshape(seq_len, 1, 3 * H)
    awi_seq = (jnp.dot(x_seq, params['rnn_awih'], preferred_element_type=jnp.float32)
               + params['rnn_abias']).reshape(seq_len, 1, H)
    w_emb = jnp.take(params['word_emb_table'], word_ids.reshape(-1), axis=0)
    wwi_seq = (jnp.dot(w_emb, params['word_wih'], preferred_element_type=jnp.float32)
               + params['word_bias']).reshape(seq_len, MAXW, 3 * H)

    grid_spec = pltpu.PrefetchScalarGridSpec(
        num_scalar_prefetch=4,
        grid=(seq_len,),
        in_specs=[
            pl.BlockSpec((1, 1, 3 * H), _step_map),      # char-cell x-projection row t
            pl.BlockSpec((1, 1, H), _step_map),          # alpha x-projection row t
            pl.BlockSpec((1, MAXW, 3 * H), _step_map),   # word-cell x-projection at t
            pl.BlockSpec((1, H), _const_map2),           # h0
            pl.BlockSpec((1, H), _const_map2),           # c0
            pl.BlockSpec((H, 3 * H), _const_map2),       # rnn_whh   (VMEM-resident)
            pl.BlockSpec((H, H), _const_map2),           # rnn_awhh  (VMEM-resident)
            pl.BlockSpec((H, 3 * H), _const_map2),       # word_whh  (VMEM-resident)
        ],
        out_specs=(
            pl.BlockSpec((1, 1, H), _step_map),          # hidden row t
            pl.BlockSpec((1, 1, H), _step_map),          # memory row t
        ),
        scratch_shapes=[
            pltpu.VMEM((1, H), jnp.float32),             # hx carry
            pltpu.VMEM((1, H), jnp.float32),             # cx carry
            pltpu.VMEM((seq_len, MAXC, H), jnp.float32)  # lattice cell deposits
        ],
    )

    h_out, c_out = pl.pallas_call(
        _lattice_kernel,
        out_shape=(jax.ShapeDtypeStruct((seq_len, 1, H), jnp.float32),
                   jax.ShapeDtypeStruct((seq_len, 1, H), jnp.float32)),
        grid_spec=grid_spec,
        compiler_params=pltpu.CompilerParams(dimension_semantics=("arbitrary",)),
    )(cnum, nwords, dep_t, dep_slot,
      wi_seq, awi_seq, wwi_seq, h0, c0,
      params['rnn_whh'], params['rnn_awhh'], params['word_whh'])

    return jnp.transpose(h_out, (1, 0, 2)), jnp.transpose(c_out, (1, 0, 2))


# ----------------------------------------------------------------------------
# Host-side lattice bookkeeping -> int32 metadata arrays (scalar prefetch)
# ----------------------------------------------------------------------------
def build_lattice_metadata(skip_input, seq_len):
    cnum = np.zeros((seq_len,), np.int32)            # skip cells arriving at position t
    nwords = np.zeros((seq_len,), np.int32)          # matched words starting at t
    word_ids = np.zeros((seq_len, MAXW), np.int32)
    dep_t = np.zeros((seq_len, MAXW), np.int32)      # deposit target positions
    dep_slot = np.full((seq_len, MAXW), MAXC - 1, np.int32)
    for t in range(seq_len):
        dep_t[t, :] = t                              # harmless self-target default
        if skip_input[t]:
            ids, lens = skip_input[t]
            n = len(ids)
            assert n == len(lens) and n <= MAXW, "too many matched words (raise MAXW)"
            nwords[t] = n
            word_ids[t, :n] = np.asarray(ids, np.int32)
            for w in range(n):
                tgt = t + int(lens[w]) - 1
                assert tgt < seq_len, "matched word extends past the sequence"
                if tgt > t:       # length-1 words are computed but never consumed
                    dep_t[t, w] = tgt
                    dep_slot[t, w] = cnum[tgt]
                    cnum[tgt] += 1
                    assert cnum[tgt] <= MAXC, "too many skip cells (raise MAXC)"
    return cnum, nwords, word_ids, dep_t.reshape(-1), dep_slot.reshape(-1)


def lattice_lstm_forward(params, inputs, skip_input, hidden=None, left2right=True):
    """inputs: (1, seq_len, input_dim) f32; skip_input: python list (len seq_len),
    each element [] or [[word_ids], [lengths]]; returns ((1,S,H), (1,S,H))."""
    assert left2right, "only forward direction implemented"
    # TODO(synk): backward direction (convert_forward_gaz_to_backward) and
    #             nn.Dropout(word_drop) (eval-mode identity) are not wired.
    H = params['rnn_whh'].shape[0]
    batch, seq_len, _ = inputs.shape
    assert batch == 1
    cnum, nwords, word_ids, dep_t, dep_slot = build_lattice_metadata(skip_input, seq_len)
    if hidden is not None:
        h0, c0 = hidden
    else:
        h0 = jnp.zeros((1, H), jnp.float32)
        c0 = jnp.zeros((1, H), jnp.float32)
    x_seq = inputs[0]                                # (seq_len, input_dim)
    return _lattice_forward_jit(
        params, x_seq,
        jnp.asarray(word_ids), jnp.asarray(cnum), jnp.asarray(nwords),
        jnp.asarray(dep_t), jnp.asarray(dep_slot), h0, c0)


# ----------------------------------------------------------------------------
# Parameters (mirrors reset_parameters shapes / inits, deterministic)
# ----------------------------------------------------------------------------
def make_params(key, input_dim, hidden_dim, word_emb_dim, word_alphabet_size):
    H = hidden_dim
    k1, k2, k3, k4 = jax.random.split(key, 4)
    eye3 = jnp.tile(jnp.eye(H, dtype=jnp.float32), (1, 3))
    return dict(
        rnn_wih=0.1 * jax.random.normal(k1, (input_dim, 3 * H), jnp.float32),
        rnn_whh=eye3,
        rnn_awih=0.1 * jax.random.normal(k2, (input_dim, H), jnp.float32),
        rnn_awhh=jnp.eye(H, dtype=jnp.float32),
        rnn_bias=jnp.zeros((1, 3 * H), jnp.float32),
        rnn_abias=jnp.zeros((1, H), jnp.float32),
        word_wih=0.1 * jax.random.normal(k3, (word_emb_dim, 3 * H), jnp.float32),
        word_whh=eye3,
        word_bias=jnp.zeros((1, 3 * H), jnp.float32),
        word_emb_table=jax.random.uniform(
            k4, (word_alphabet_size, word_emb_dim), jnp.float32,
            minval=-np.sqrt(3.0 / word_emb_dim), maxval=np.sqrt(3.0 / word_emb_dim)),
    )


# ----------------------------------------------------------------------------
# Pure-numpy reference (mirrors the PyTorch forward) for a correctness check
# ----------------------------------------------------------------------------
def lattice_lstm_reference(p, inputs, skip_input):
    def sig(v):
        return 1.0 / (1.0 + np.exp(-v))
    H = p['rnn_whh'].shape[0]
    x = np.asarray(inputs)[0]
    seq_len = x.shape[0]
    hx = np.zeros((1, H), np.float32)
    cx = np.zeros((1, H), np.float32)
    input_c = [[] for _ in range(seq_len)]
    hs, cs = [], []
    for t in range(seq_len):
        gates = x[t:t + 1] @ p['rnn_wih'] + p['rnn_bias'] + hx @ p['rnn_whh']
        i = sig(gates[:, :H]); o = sig(gates[:, H:2 * H]); g = np.tanh(gates[:, 2 * H:])
        if len(input_c[t]) == 0:
            cx = (1.0 - i) * cx + i * g
        else:
            cbuf = np.concatenate(input_c[t], 0)
            awi = x[t:t + 1] @ p['rnn_awih'] + p['rnn_abias']
            alpha = sig(awi + cbuf @ p['rnn_awhh'])
            allv = np.exp(np.concatenate([i, alpha], 0))
            allv = allv / allv.sum(0, keepdims=True)
            merge = np.concatenate([g, cbuf], 0)
            cx = (merge * allv).sum(0, keepdims=True)
        hx = o * np.tanh(cx)
        hs.append(hx); cs.append(cx)
        if skip_input[t]:
            ids, lens = skip_input[t]
            wemb = p['word_emb_table'][np.asarray(ids)]
            wg = wemb @ p['word_wih'] + p['word_bias'] + hx @ p['word_whh']
            f = sig(wg[:, :H]); iw = sig(wg[:, H:2 * H]); gw = np.tanh(wg[:, 2 * H:])
            ct = f * cx + iw * gw
            for idx in range(len(ids)):
                input_c[t + int(lens[idx]) - 1].append(ct[idx:idx + 1])
    return np.concatenate(hs, 0)[None], np.concatenate(cs, 0)[None]


# ----------------------------------------------------------------------------
if __name__ == "__main__":
    key = jax.random.PRNGKey(0)
    input_dim = 32
    hidden_dim = 32
    word_emb_dim = 32
    word_alphabet_size = 50
    seq_len = 8
    batch = 1

    kp, kx = jax.random.split(key)
    params = make_params(kp, input_dim, hidden_dim, word_emb_dim, word_alphabet_size)
    x = jax.random.normal(kx, (batch, seq_len, input_dim), jnp.float32)

    # lattice skip structure: [[], [[word_ids],[lengths]], ...]
    skip_input = [[] for _ in range(seq_len)]
    skip_input[1] = [[5, 7], [2, 3]]     # words of length 2 and 3 starting at t=1
    skip_input[4] = [[12], [3]]          # word of length 3 starting at t=4

    out_h, out_c = lattice_lstm_forward(params, x, skip_input, left2right=True)
    jax.block_until_ready((out_h, out_c))
    assert out_h.shape == (1, seq_len, hidden_dim)
    assert out_c.shape == (1, seq_len, hidden_dim)

    # correctness check against a pure-numpy reference of the PyTorch forward
    params_np = jax.tree_util.tree_map(np.asarray, params)
    ref_h, ref_c = lattice_lstm_reference(params_np, np.asarray(x), skip_input)
    np.testing.assert_allclose(np.asarray(out_h), ref_h, rtol=1e-2, atol=1e-2)
    np.testing.assert_allclose(np.asarray(out_c), ref_c, rtol=1e-2, atol=1e-2)
    print("KERNEL_OK")
</pallas_src>

<mosaic_0001>
module attributes {stable_mosaic.version = 11 : i64} {
  func.func @_lattice_kernel(%arg0: i32, %arg1: memref<8xi32, #tpu.memory_space<smem>>, %arg2: memref<8xi32, #tpu.memory_space<smem>>, %arg3: memref<64xi32, #tpu.memory_space<smem>>, %arg4: memref<64xi32, #tpu.memory_space<smem>>, %arg5: memref<1x1x96xf32, #tpu.memory_space<vmem>>, %arg6: memref<1x1x32xf32, #tpu.memory_space<vmem>>, %arg7: memref<1x8x96xf32, #tpu.memory_space<vmem>>, %arg8: memref<1x32xf32, #tpu.memory_space<vmem>>, %arg9: memref<1x32xf32, #tpu.memory_space<vmem>>, %arg10: memref<32x96xf32, #tpu.memory_space<vmem>>, %arg11: memref<32x32xf32, #tpu.memory_space<vmem>>, %arg12: memref<32x96xf32, #tpu.memory_space<vmem>>, %arg13: memref<1x1x32xf32, #tpu.memory_space<vmem>>, %arg14: memref<1x1x32xf32, #tpu.memory_space<vmem>>, %arg15: memref<1x32xf32, #tpu.memory_space<vmem>>, %arg16: memref<1x32xf32, #tpu.memory_space<vmem>>, %arg17: memref<8x8x32xf32, #tpu.memory_space<vmem>>) attributes {dimension_semantics = [#tpu.dimension_semantics<arbitrary>], iteration_bounds = array<i64: 8>, scalar_prefetch = 4 : i64, scratch_operands = 3 : i64, tpu.core_type = #tpu.core_type<tc>, window_params = [{transform_indices = @transform_0, window_bounds = array<i64: 1, 1, 96>}, {transform_indices = @transform_1, window_bounds = array<i64: 1, 1, 32>}, {transform_indices = @transform_2, window_bounds = array<i64: 1, 8, 96>}, {pipeline_mode = #tpu.pipeline_mode<synchronous>, transform_indices = @transform_3, window_bounds = array<i64: 1, 32>}, {pipeline_mode = #tpu.pipeline_mode<synchronous>, transform_indices = @transform_4, window_bounds = array<i64: 1, 32>}, {pipeline_mode = #tpu.pipeline_mode<synchronous>, transform_indices = @transform_5, window_bounds = array<i64: 32, 96>}, {pipeline_mode = #tpu.pipeline_mode<synchronous>, transform_indices = @transform_6, window_bounds = array<i64: 32, 32>}, {pipeline_mode = #tpu.pipeline_mode<synchronous>, transform_indices = @transform_7, window_bounds = array<i64: 32, 96>}, {transform_indices = @transform_8, window_bounds = array<i64: 1, 1, 32>}, {transform_indices = @transform_9, window_bounds = array<i64: 1, 1, 32>}]} {
    %c0_i32 = arith.constant 0 : i32
    %0 = arith.cmpi eq, %arg0, %c0_i32 : i32
    %1 = arith.extui %0 : i1 to i32
    %c0_i32_0 = arith.constant 0 : i32
    %2 = arith.cmpi ne, %1, %c0_i32_0 : i32
    scf.if %2 {
      %c0_28 = arith.constant 0 : index
      %c0_29 = arith.constant 0 : index
      %48 = vector.load %arg8[%c0_28, %c0_29] : memref<1x32xf32, #tpu.memory_space<vmem>>, vector<1x32xf32>
      %c0_30 = arith.constant 0 : index
      %c0_31 = arith.constant 0 : index
      %49 = vector.load %arg15[%c0_30, %c0_31] : memref<1x32xf32, #tpu.memory_space<vmem>>, vector<1x32xf32>
      tpu.vector_store %arg15[%c0_30, %c0_31], %48 {strides = array<i32>} : memref<1x32xf32, #tpu.memory_space<vmem>>, vector<1x32xf32>,
      %c0_32 = arith.constant 0 : index
      %c0_33 = arith.constant 0 : index
      %50 = vector.load %arg9[%c0_32, %c0_33] : memref<1x32xf32, #tpu.memory_space<vmem>>, vector<1x32xf32>
      %c0_34 = arith.constant 0 : index
      %c0_35 = arith.constant 0 : index
      %51 = vector.load %arg16[%c0_34, %c0_35] : memref<1x32xf32, #tpu.memory_space<vmem>>, vector<1x32xf32>
      tpu.vector_store %arg16[%c0_34, %c0_35], %50 {strides = array<i32>} : memref<1x32xf32, #tpu.memory_space<vmem>>, vector<1x32xf32>,
      %cst_36 = arith.constant 0.000000e+00 : f32
      %52 = vector.broadcast %cst_36 : f32 to vector<8x8x32xf32>
      %c0_37 = arith.constant 0 : index
      %c0_38 = arith.constant 0 : index
      %c0_39 = arith.constant 0 : index
      %53 = vector.load %arg17[%c0_37, %c0_38, %c0_39] : memref<8x8x32xf32, #tpu.memory_space<vmem>>, vector<8x8x32xf32>
      tpu.vector_store %arg17[%c0_37, %c0_38, %c0_39], %52 {strides = array<i32>} : memref<8x8x32xf32, #tpu.memory_space<vmem>>, vector<8x8x32xf32>,
    } else {
    }
    %c0 = arith.constant 0 : index
    %c0_1 = arith.constant 0 : index
    %3 = vector.load %arg15[%c0, %c0_1] : memref<1x32xf32, #tpu.memory_space<vmem>>, vector<1x32xf32>
    %c0_2 = arith.constant 0 : index
    %c0_3 = arith.constant 0 : index
    %4 = vector.load %arg16[%c0_2, %c0_3] : memref<1x32xf32, #tpu.memory_space<vmem>>, vector<1x32xf32>
    %5 = arith.index_cast %arg0 : i32 to index
    %6 = memref.load %arg1[%5] : memref<8xi32, #tpu.memory_space<smem>>
    %c0_4 = arith.constant 0 : index
    %c0_5 = arith.constant 0 : index
    %c0_6 = arith.constant 0 : index
    %7 = vector.load %arg5[%c0_4, %c0_5, %c0_6] : memref<1x1x96xf32, #tpu.memory_space<vmem>>, vector<1x1x96xf32>
    %8 = vector.shape_cast %7 : vector<1x1x96xf32> to vector<1x96xf32>
    %c0_7 = arith.constant 0 : index
    %c0_8 = arith.constant 0 : index
    %9 = vector.load %arg10[%c0_7, %c0_8] : memref<32x96xf32, #tpu.memory_space<vmem>>, vector<32x96xf32>
    %cst = arith.constant dense<0.000000e+00> : vector<1x96xf32>
    %10 = tpu.matmul %3, %9, %cst {dimension_numbers = #tpu.dot_dimension_numbers<[1], [0], [0], [1], [0, 0, 1, 1], [], []>} : vector<1x32xf32>, vector<32x96xf32>, vector<1x96xf32> -> vector<1x96xf32>
    %11 = arith.addf %8, %10 : vector<1x96xf32>
    %12 = vector.extract_strided_slice %11 {offsets = [0, 0], sizes = [1, 32], strides = [1, 1]} : vector<1x96xf32> to vector<1x32xf32>
    %13 = arith.negf %12 : vector<1x32xf32>
    %14 = math.exp %13 : vector<1x32xf32>
    %cst_9 = arith.constant 1.000000e+00 : f32
    %15 = vector.broadcast %cst_9 : f32 to vector<1x32xf32>
    %16 = arith.addf %15, %14 : vector<1x32xf32>
    %17 = arith.divf %15, %16 : vector<1x32xf32>
    %18 = vector.extract_strided_slice %11 {offsets = [0, 32], sizes = [1, 32], strides = [1, 1]} : vector<1x96xf32> to vector<1x32xf32>
    %19 = arith.negf %18 : vector<1x32xf32>
    %20 = math.exp %19 : vector<1x32xf32>
    %cst_10 = arith.constant 1.000000e+00 : f32
    %21 = vector.broadcast %cst_10 : f32 to vector<1x32xf32>
    %22 = arith.addf %21, %20 : vector<1x32xf32>
    %23 = arith.divf %21, %22 : vector<1x32xf32>
    %24 = vector.extract_strided_slice %11 {offsets = [0, 64], sizes = [1, 32], strides = [1, 1]} : vector<1x96xf32> to vector<1x32xf32>
    %25 = math.tanh %24 : vector<1x32xf32>
    %cst_11 = arith.constant 1.000000e+00 : f32
    %26 = vector.broadcast %cst_11 : f32 to vector<1x32xf32>
    %27 = arith.subf %26, %17 : vector<1x32xf32>
    %28 = arith.mulf %27, %4 : vector<1x32xf32>
    %29 = arith.mulf %17, %25 : vector<1x32xf32>
    %30 = arith.addf %28, %29 : vector<1x32xf32>
    %c0_12 = arith.constant 0 : index
    %c0_13 = arith.constant 0 : index
    %31 = vector.load %arg16[%c0_12, %c0_13] : memref<1x32xf32, #tpu.memory_space<vmem>>, vector<1x32xf32>
    tpu.vector_store %arg16[%c0_12, %c0_13], %30 {strides = array<i32>} : memref<1x32xf32, #tpu.memory_space<vmem>>, vector<1x32xf32>,
    %c0_i32_14 = arith.constant 0 : i32
    %32 = arith.cmpi sgt, %6, %c0_i32_14 : i32
    %33 = arith.extui %32 : i1 to i32
    %c0_i32_15 = arith.constant 0 : i32
    %34 = arith.cmpi ne, %33, %c0_i32_15 : i32
    scf.if %34 {
      %48 = arith.index_cast %arg0 : i32 to index
      %c0_28 = arith.constant 0 : index
      %c0_29 = arith.constant 0 : index
      %49 = vector.load %arg17[%48, %c0_28, %c0_29] : memref<8x8x32xf32, #tpu.memory_space<vmem>>, vector<1x8x32xf32>
      %50 = vector.shape_cast %49 : vector<1x8x32xf32> to vector<8x32xf32>
      %c0_30 = arith.constant 0 : index
      %c0_31 = arith.constant 0 : index
      %51 = vector.load %arg11[%c0_30, %c0_31] : memref<32x32xf32, #tpu.memory_space<vmem>>, vector<32x32xf32>
      %cst_32 = arith.constant dense<0.000000e+00> : vector<8x32xf32>
      %52 = tpu.matmul %50, %51, %cst_32 {dimension_numbers = #tpu.dot_dimension_numbers<[1], [0], [0], [1], [0, 0, 1, 1], [], []>} : vector<8x32xf32>, vector<32x32xf32>, vector<8x32xf32> -> vector<8x32xf32>
      %c0_33 = arith.constant 0 : index
      %c0_34 = arith.constant 0 : index
      %c0_35 = arith.constant 0 : index
      %53 = vector.load %arg6[%c0_33, %c0_34, %c0_35] : memref<1x1x32xf32, #tpu.memory_space<vmem>>, vector<1x1x32xf32>
      %54 = vector.shape_cast %53 : vector<1x1x32xf32> to vector<1x32xf32>
      %55 = vector.broadcast %54 : vector<1x32xf32> to vector<8x32xf32>
      %56 = arith.addf %55, %52 : vector<8x32xf32>
      %57 = arith.negf %56 : vector<8x32xf32>
      %58 = math.exp %57 : vector<8x32xf32>
      %cst_36 = arith.constant 1.000000e+00 : f32
      %59 = vector.broadcast %cst_36 : f32 to vector<8x32xf32>
      %60 = arith.addf %59, %58 : vector<8x32xf32>
      %61 = arith.divf %59, %60 : vector<8x32xf32>
      %62 = tpu.iota {dimensions = array<i32: 0>} : vector<8x32xi32>
      %63 = vector.broadcast %6 : i32 to vector<8x32xi32>
      %64 = arith.cmpi slt, %62, %63 : vector<8x32xi32>
      %65 = math.exp %17 : vector<1x32xf32>
      %66 = math.exp %61 : vector<8x32xf32>
      %cst_37 = arith.constant 0.000000e+00 : f32
      %67 = vector.broadcast %cst_37 : f32 to vector<8x32xf32>
      %68 = arith.select %64, %66, %67 : vector<8x32xi1>, vector<8x32xf32>
      %cst_38 = arith.constant dense<0.000000e+00> : vector<32xf32>
      %69 = vector.multi_reduction <add>, %68, %cst_38 [0] : vector<8x32xf32> to vector<32xf32>
      %70 = vector.shape_cast %69 : vector<32xf32> to vector<1x32xf32>
      %71 = arith.addf %65, %70 : vector<1x32xf32>
      %72 = tpu.reciprocal %71 {approx = true} : vector<1x32xf32> -> vector<1x32xf32>
      %cst_39 = arith.constant 0.000000e+00 : f32
      %73 = vector.broadcast %cst_39 : f32 to vector<8x32xf32>
      %74 = arith.select %64, %50, %73 : vector<8x32xi1>, vector<8x32xf32>
      %75 = arith.mulf %65, %72 : vector<1x32xf32>
      %76 = arith.mulf %75, %25 : vector<1x32xf32>
      %77 = vector.broadcast %72 : vector<1x32xf32> to vector<8x32xf32>
      %78 = arith.mulf %68, %77 : vector<8x32xf32>
      %79 = arith.mulf %78, %74 : vector<8x32xf32>
      %cst_40 = arith.constant dense<0.000000e+00> : vector<32xf32>
      %80 = vector.multi_reduction <add>, %79, %cst_40 [0] : vector<8x32xf32> to vector<32xf32>
      %81 = vector.shape_cast %80 : vector<32xf32> to vector<1x32xf32>
      %82 = arith.addf %76, %81 : vector<1x32xf32>
      %c0_41 = arith.constant 0 : index
      %c0_42 = arith.constant 0 : index
      %83 = vector.load %arg16[%c0_41, %c0_42] : memref<1x32xf32, #tpu.memory_space<vmem>>, vector<1x32xf32>
      tpu.vector_store %arg16[%c0_41, %c0_42], %82 {strides = array<i32>} : memref<1x32xf32, #tpu.memory_space<vmem>>, vector<1x32xf32>,
    } else {
    }
    %c0_16 = arith.constant 0 : index
    %c0_17 = arith.constant 0 : index
    %35 = vector.load %arg16[%c0_16, %c0_17] : memref<1x32xf32, #tpu.memory_space<vmem>>, vector<1x32xf32>
    %36 = math.tanh %35 : vector<1x32xf32>
    %37 = arith.mulf %23, %36 : vector<1x32xf32>
    %c0_18 = arith.constant 0 : index
    %c0_19 = arith.constant 0 : index
    %38 = vector.load %arg15[%c0_18, %c0_19] : memref<1x32xf32, #tpu.memory_space<vmem>>, vector<1x32xf32>
    tpu.vector_store %arg15[%c0_18, %c0_19], %37 {strides = array<i32>} : memref<1x32xf32, #tpu.memory_space<vmem>>, vector<1x32xf32>,
    %39 = vector.shape_cast %37 : vector<1x32xf32> to vector<1x1x32xf32>
    %c0_20 = arith.constant 0 : index
    %c0_21 = arith.constant 0 : index
    %c0_22 = arith.constant 0 : index
    %40 = vector.load %arg13[%c0_20, %c0_21, %c0_22] : memref<1x1x32xf32, #tpu.memory_space<vmem>>, vector<1x1x32xf32>
    tpu.vector_store %arg13[%c0_20, %c0_21, %c0_22], %39 {strides = array<i32>} : memref<1x1x32xf32, #tpu.memory_space<vmem>>, vector<1x1x32xf32>,
    %41 = vector.shape_cast %35 : vector<1x32xf32> to vector<1x1x32xf32>
    %c0_23 = arith.constant 0 : index
    %c0_24 = arith.constant 0 : index
    %c0_25 = arith.constant 0 : index
    %42 = vector.load %arg14[%c0_23, %c0_24, %c0_25] : memref<1x1x32xf32, #tpu.memory_space<vmem>>, vector<1x1x32xf32>
    tpu.vector_store %arg14[%c0_23, %c0_24, %c0_25], %41 {strides = array<i32>} : memref<1x1x32xf32, #tpu.memory_space<vmem>>, vector<1x1x32xf32>,
    %43 = arith.index_cast %arg0 : i32 to index
    %44 = memref.load %arg2[%43] : memref<8xi32, #tpu.memory_space<smem>>
    %c0_i32_26 = arith.constant 0 : i32
    %45 = arith.cmpi sgt, %44, %c0_i32_26 : i32
    %46 = arith.extui %45 : i1 to i32
    %c0_i32_27 = arith.constant 0 : i32
    %47 = arith.cmpi ne, %46, %c0_i32_27 : i32
    scf.if %47 {
      %c0_28 = arith.constant 0 : index
      %c0_29 = arith.constant 0 : index
      %c0_30 = arith.constant 0 : index
      %48 = vector.load %arg7[%c0_28, %c0_29, %c0_30] : memref<1x8x96xf32, #tpu.memory_space<vmem>>, vector<1x8x96xf32>
      %49 = vector.shape_cast %48 : vector<1x8x96xf32> to vector<8x96xf32>
      %c0_31 = arith.constant 0 : index
      %c0_32 = arith.constant 0 : index
      %50 = vector.load %arg12[%c0_31, %c0_32] : memref<32x96xf32, #tpu.memory_space<vmem>>, vector<32x96xf32>
      %cst_33 = arith.constant dense<0.000000e+00> : vector<1x96xf32>
      %51 = tpu.matmul %37, %50, %cst_33 {dimension_numbers = #tpu.dot_dimension_numbers<[1], [0], [0], [1], [0, 0, 1, 1], [], []>} : vector<1x32xf32>, vector<32x96xf32>, vector<1x96xf32> -> vector<1x96xf32>
      %52 = vector.broadcast %51 : vector<1x96xf32> to vector<8x96xf32>
      %53 = arith.addf %49, %52 : vector<8x96xf32>
      %54 = vector.extract_strided_slice %53 {offsets = [0, 0], sizes = [8, 32], strides = [1, 1]} : vector<8x96xf32> to vector<8x32xf32>
      %55 = arith.negf %54 : vector<8x32xf32>
      %56 = math.exp %55 : vector<8x32xf32>
      %cst_34 = arith.constant 1.000000e+00 : f32
      %57 = vector.broadcast %cst_34 : f32 to vector<8x32xf32>
      %58 = arith.addf %57, %56 : vector<8x32xf32>
      %59 = arith.divf %57, %58 : vector<8x32xf32>
      %60 = vector.extract_strided_slice %53 {offsets = [0, 32], sizes = [8, 32], strides = [1, 1]} : vector<8x96xf32> to vector<8x32xf32>
      %61 = arith.negf %60 : vector<8x32xf32>
      %62 = math.exp %61 : vector<8x32xf32>
      %cst_35 = arith.constant 1.000000e+00 : f32
      %63 = vector.broadcast %cst_35 : f32 to vector<8x32xf32>
      %64 = arith.addf %63, %62 : vector<8x32xf32>
      %65 = arith.divf %63, %64 : vector<8x32xf32>
      %66 = vector.extract_strided_slice %53 {offsets = [0, 64], sizes = [8, 32], strides = [1, 1]} : vector<8x96xf32> to vector<8x32xf32>
      %67 = math.tanh %66 : vector<8x32xf32>
      %68 = vector.broadcast %35 : vector<1x32xf32> to vector<8x32xf32>
      %69 = arith.mulf %59, %68 : vector<8x32xf32>
      %70 = arith.mulf %65, %67 : vector<8x32xf32>
      %71 = arith.addf %69, %70 : vector<8x32xf32>
      %72 = tpu.iota {dimensions = array<i32: 0>} : vector<8x32xi32>
      %c0_i32_36 = arith.constant 0 : i32
      %73 = arith.cmpi sgt, %44, %c0_i32_36 : i32
      %74 = arith.extui %73 : i1 to i32
      %c0_i32_37 = arith.constant 0 : i32
      %75 = arith.cmpi ne, %74, %c0_i32_37 : i32
      scf.if %75 {
        %c8_i32 = arith.constant 8 : i32
        %97 = arith.muli %arg0, %c8_i32 : i32
        %c0_i32_45 = arith.constant 0 : i32
        %98 = arith.addi %97, %c0_i32_45 : i32
        %99 = arith.index_cast %98 : i32 to index
        %100 = memref.load %arg3[%99] : memref<64xi32, #tpu.memory_space<smem>>
        %c8_i32_46 = arith.constant 8 : i32
        %101 = arith.muli %arg0, %c8_i32_46 : i32
        %c0_i32_47 = arith.constant 0 : i32
        %102 = arith.addi %101, %c0_i32_47 : i32
        %103 = arith.index_cast %102 : i32 to index
        %104 = memref.load %arg4[%103] : memref<64xi32, #tpu.memory_space<smem>>
        %105 = vector.broadcast %104 : i32 to vector<8x32xi32>
        %106 = arith.cmpi eq, %72, %105 : vector<8x32xi32>
        %107 = vector.extract_strided_slice %71 {offsets = [0, 0], sizes = [1, 32], strides = [1, 1]} : vector<8x32xf32> to vector<1x32xf32>
        %108 = arith.index_cast %100 : i32 to index
        %c0_48 = arith.constant 0 : index
        %c0_49 = arith.constant 0 : index
        %109 = vector.load %arg17[%108, %c0_48, %c0_49] : memref<8x8x32xf32, #tpu.memory_space<vmem>>, vector<1x8x32xf32>
        %110 = vector.shape_cast %109 : vector<1x8x32xf32> to vector<8x32xf32>
        %111 = vector.shape_cast %107 : vector<1x32xf32> to vector<1x32xf32>
        %112 = vector.broadcast %111 : vector<1x32xf32> to vector<8x32xf32>
        %113 = arith.select %106, %112, %110 : vector<8x32xi1>, vector<8x32xf32>
        %114 = arith.index_cast %100 : i32 to index
        %c0_50 = arith.constant 0 : index
        %c0_51 = arith.constant 0 : index
        %115 = vector.load %arg17[%114, %c0_50, %c0_51] : memref<8x8x32xf32, #tpu.memory_space<vmem>>, vector<1x8x32xf32>
        %116 = vector.shape_cast %115 : vector<1x8x32xf32> to vector<8x32xf32>
        %117 = vector.shape_cast %113 : vector<8x32xf32> to vector<1x8x32xf32>
        tpu.vector_store %arg17[%114, %c0_50, %c0_51], %117 {strides = array<i32>} : memref<8x8x32xf32, #tpu.memory_space<vmem>>, vector<1x8x32xf32>,
      } else {
      }
      %c1_i32 = arith.constant 1 : i32
      %76 = arith.cmpi sgt, %44, %c1_i32 : i32
      %77 = arith.extui %76 : i1 to i32
      %c0_i32_38 = arith.constant 0 : i32
      %78 = arith.cmpi ne, %77, %c0_i32_38 : i32
      scf.if %78 {
        %c8_i32 = arith.constant 8 : i32
        %97 = arith.muli %arg0, %c8_i32 : i32
        %c1_i32_45 = arith.constant 1 : i32
        %98 = arith.addi %97, %c1_i32_45 : i32
        %99 = arith.index_cast %98 : i32 to index
        %100 = memref.load %arg3[%99] : memref<64xi32, #tpu.memory_space<smem>>
        %c8_i32_46 = arith.constant 8 : i32
        %101 = arith.muli %arg0, %c8_i32_46 : i32
        %c1_i32_47 = arith.constant 1 : i32
        %102 = arith.addi %101, %c1_i32_47 : i32
        %103 = arith.index_cast %102 : i32 to index
        %104 = memref.load %arg4[%103] : memref<64xi32, #tpu.memory_space<smem>>
        %105 = vector.broadcast %104 : i32 to vector<8x32xi32>
        %106 = arith.cmpi eq, %72, %105 : vector<8x32xi32>
        %107 = vector.extract_strided_slice %71 {offsets = [1, 0], sizes = [1, 32], strides = [1, 1]} : vector<8x32xf32> to vector<1x32xf32>
        %108 = arith.index_cast %100 : i32 to index
        %c0_48 = arith.constant 0 : index
        %c0_49 = arith.constant 0 : index
        %109 = vector.load %arg17[%108, %c0_48, %c0_49] : memref<8x8x32xf32, #tpu.memory_space<vmem>>, vector<1x8x32xf32>
        %110 = vector.shape_cast %109 : vector<1x8x32xf32> to vector<8x32xf32>
        %111 = vector.shape_cast %107 : vector<1x32xf32> to vector<1x32xf32>
        %112 = vector.broadcast %111 : vector<1x32xf32> to vector<8x32xf32>
        %113 = arith.select %106, %112, %110 : vector<8x32xi1>, vector<8x32xf32>
        %114 = arith.index_cast %100 : i32 to index
        %c0_50 = arith.constant 0 : index
        %c0_51 = arith.constant 0 : index
        %115 = vector.load %arg17[%114, %c0_50, %c0_51] : memref<8x8x32xf32, #tpu.memory_space<vmem>>, vector<1x8x32xf32>
        %116 = vector.shape_cast %115 : vector<1x8x32xf32> to vector<8x32xf32>
        %117 = vector.shape_cast %113 : vector<8x32xf32> to vector<1x8x32xf32>
        tpu.vector_store %arg17[%114, %c0_50, %c0_51], %117 {strides = array<i32>} : memref<8x8x32xf32, #tpu.memory_space<vmem>>, vector<1x8x32xf32>,
      } else {
      }
      %c2_i32 = arith.constant 2 : i32
      %79 = arith.cmpi sgt, %44, %c2_i32 : i32
      %80 = arith.extui %79 : i1 to i32
      %c0_i32_39 = arith.constant 0 : i32
      %81 = arith.cmpi ne, %80, %c0_i32_39 : i32
      scf.if %81 {
        %c8_i32 = arith.constant 8 : i32
        %97 = arith.muli %arg0, %c8_i32 : i32
        %c2_i32_45 = arith.constant 2 : i32
        %98 = arith.addi %97, %c2_i32_45 : i32
        %99 = arith.index_cast %98 : i32 to index
        %100 = memref.load %arg3[%99] : memref<64xi32, #tpu.memory_space<smem>>
        %c8_i32_46 = arith.constant 8 : i32
        %101 = arith.muli %arg0, %c8_i32_46 : i32
        %c2_i32_47 = arith.constant 2 : i32
        %102 = arith.addi %101, %c2_i32_47 : i32
        %103 = arith.index_cast %102 : i32 to index
        %104 = memref.load %arg4[%103] : memref<64xi32, #tpu.memory_space<smem>>
        %105 = vector.broadcast %104 : i32 to vector<8x32xi32>
        %106 = arith.cmpi eq, %72, %105 : vector<8x32xi32>
        %107 = vector.extract_strided_slice %71 {offsets = [2, 0], sizes = [1, 32], strides = [1, 1]} : vector<8x32xf32> to vector<1x32xf32>
        %108 = arith.index_cast %100 : i32 to index
        %c0_48 = arith.constant 0 : index
        %c0_49 = arith.constant 0 : index
        %109 = vector.load %arg17[%108, %c0_48, %c0_49] : memref<8x8x32xf32, #tpu.memory_space<vmem>>, vector<1x8x32xf32>
        %110 = vector.shape_cast %109 : vector<1x8x32xf32> to vector<8x32xf32>
        %111 = vector.shape_cast %107 : vector<1x32xf32> to vector<1x32xf32>
        %112 = vector.broadcast %111 : vector<1x32xf32> to vector<8x32xf32>
        %113 = arith.select %106, %112, %110 : vector<8x32xi1>, vector<8x32xf32>
        %114 = arith.index_cast %100 : i32 to index
        %c0_50 = arith.constant 0 : index
        %c0_51 = arith.constant 0 : index
        %115 = vector.load %arg17[%114, %c0_50, %c0_51] : memref<8x8x32xf32, #tpu.memory_space<vmem>>, vector<1x8x32xf32>
        %116 = vector.shape_cast %115 : vector<1x8x32xf32> to vector<8x32xf32>
        %117 = vector.shape_cast %113 : vector<8x32xf32> to vector<1x8x32xf32>
        tpu.vector_store %arg17[%114, %c0_50, %c0_51], %117 {strides = array<i32>} : memref<8x8x32xf32, #tpu.memory_space<vmem>>, vector<1x8x32xf32>,
      } else {
      }
      %c3_i32 = arith.constant 3 : i32
      %82 = arith.cmpi sgt, %44, %c3_i32 : i32
      %83 = arith.extui %82 : i1 to i32
      %c0_i32_40 = arith.constant 0 : i32
      %84 = arith.cmpi ne, %83, %c0_i32_40 : i32
      scf.if %84 {
        %c8_i32 = arith.constant 8 : i32
        %97 = arith.muli %arg0, %c8_i32 : i32
        %c3_i32_45 = arith.constant 3 : i32
        %98 = arith.addi %97, %c3_i32_45 : i32
        %99 = arith.index_cast %98 : i32 to index
        %100 = memref.load %arg3[%99] : memref<64xi32, #tpu.memory_space<smem>>
        %c8_i32_46 = arith.constant 8 : i32
        %101 = arith.muli %arg0, %c8_i32_46 : i32
        %c3_i32_47 = arith.constant 3 : i32
        %102 = arith.addi %101, %c3_i32_47 : i32
        %103 = arith.index_cast %102 : i32 to index
        %104 = memref.load %arg4[%103] : memref<64xi32, #tpu.memory_space<smem>>
        %105 = vector.broadcast %104 : i32 to vector<8x32xi32>
        %106 = arith.cmpi eq, %72, %105 : vector<8x32xi32>
        %107 = vector.extract_strided_slice %71 {offsets = [3, 0], sizes = [1, 32], strides = [1, 1]} : vector<8x32xf32> to vector<1x32xf32>
        %108 = arith.index_cast %100 : i32 to index
        %c0_48 = arith.constant 0 : index
        %c0_49 = arith.constant 0 : index
        %109 = vector.load %arg17[%108, %c0_48, %c0_49] : memref<8x8x32xf32, #tpu.memory_space<vmem>>, vector<1x8x32xf32>
        %110 = vector.shape_cast %109 : vector<1x8x32xf32> to vector<8x32xf32>
        %111 = vector.shape_cast %107 : vector<1x32xf32> to vector<1x32xf32>
        %112 = vector.broadcast %111 : vector<1x32xf32> to vector<8x32xf32>
        %113 = arith.select %106, %112, %110 : vector<8x32xi1>, vector<8x32xf32>
        %114 = arith.index_cast %100 : i32 to index
        %c0_50 = arith.constant 0 : index
        %c0_51 = arith.constant 0 : index
        %115 = vector.load %arg17[%114, %c0_50, %c0_51] : memref<8x8x32xf32, #tpu.memory_space<vmem>>, vector<1x8x32xf32>
        %116 = vector.shape_cast %115 : vector<1x8x32xf32> to vector<8x32xf32>
        %117 = vector.shape_cast %113 : vector<8x32xf32> to vector<1x8x32xf32>
        tpu.vector_store %arg17[%114, %c0_50, %c0_51], %117 {strides = array<i32>} : memref<8x8x32xf32, #tpu.memory_space<vmem>>, vector<1x8x32xf32>,
      } else {
      }
      %c4_i32 = arith.constant 4 : i32
      %85 = arith.cmpi sgt, %44, %c4_i32 : i32
      %86 = arith.extui %85 : i1 to i32
      %c0_i32_41 = arith.constant 0 : i32
      %87 = arith.cmpi ne, %86, %c0_i32_41 : i32
      scf.if %87 {
        %c8_i32 = arith.constant 8 : i32
        %97 = arith.muli %arg0, %c8_i32 : i32
        %c4_i32_45 = arith.constant 4 : i32
        %98 = arith.addi %97, %c4_i32_45 : i32
        %99 = arith.index_cast %98 : i32 to index
        %100 = memref.load %arg3[%99] : memref<64xi32, #tpu.memory_space<smem>>
        %c8_i32_46 = arith.constant 8 : i32
        %101 = arith.muli %arg0, %c8_i32_46 : i32
        %c4_i32_47 = arith.constant 4 : i32
        %102 = arith.addi %101, %c4_i32_47 : i32
        %103 = arith.index_cast %102 : i32 to index
        %104 = memref.load %arg4[%103] : memref<64xi32, #tpu.memory_space<smem>>
        %105 = vector.broadcast %104 : i32 to vector<8x32xi32>
        %106 = arith.cmpi eq, %72, %105 : vector<8x32xi32>
        %107 = vector.extract_strided_slice %71 {offsets = [4, 0], sizes = [1, 32], strides = [1, 1]} : vector<8x32xf32> to vector<1x32xf32>
        %108 = arith.index_cast %100 : i32 to index
        %c0_48 = arith.constant 0 : index
        %c0_49 = arith.constant 0 : index
        %109 = vector.load %arg17[%108, %c0_48, %c0_49] : memref<8x8x32xf32, #tpu.memory_space<vmem>>, vector<1x8x32xf32>
        %110 = vector.shape_cast %109 : vector<1x8x32xf32> to vector<8x32xf32>
        %111 = vector.shape_cast %107 : vector<1x32xf32> to vector<1x32xf32>
        %112 = vector.broadcast %111 : vector<1x32xf32> to vector<8x32xf32>
        %113 = arith.select %106, %112, %110 : vector<8x32xi1>, vector<8x32xf32>
        %114 = arith.index_cast %100 : i32 to index
        %c0_50 = arith.constant 0 : index
        %c0_51 = arith.constant 0 : index
        %115 = vector.load %arg17[%114, %c0_50, %c0_51] : memref<8x8x32xf32, #tpu.memory_space<vmem>>, vector<1x8x32xf32>
        %116 = vector.shape_cast %115 : vector<1x8x32xf32> to vector<8x32xf32>
        %117 = vector.shape_cast %113 : vector<8x32xf32> to vector<1x8x32xf32>
        tpu.vector_store %arg17[%114, %c0_50, %c0_51], %117 {strides = array<i32>} : memref<8x8x32xf32, #tpu.memory_space<vmem>>, vector<1x8x32xf32>,
      } else {
      }
      %c5_i32 = arith.constant 5 : i32
      %88 = arith.cmpi sgt, %44, %c5_i32 : i32
      %89 = arith.extui %88 : i1 to i32
      %c0_i32_42 = arith.constant 0 : i32
      %90 = arith.cmpi ne, %89, %c0_i32_42 : i32
      scf.if %90 {
        %c8_i32 = arith.constant 8 : i32
        %97 = arith.muli %arg0, %c8_i32 : i32
        %c5_i32_45 = arith.constant 5 : i32
        %98 = arith.addi %97, %c5_i32_45 : i32
        %99 = arith.index_cast %98 : i32 to index
        %100 = memref.load %arg3[%99] : memref<64xi32, #tpu.memory_space<smem>>
        %c8_i32_46 = arith.constant 8 : i32
        %101 = arith.muli %arg0, %c8_i32_46 : i32
        %c5_i32_47 = arith.constant 5 : i32
        %102 = arith.addi %101, %c5_i32_47 : i32
        %103 = arith.index_cast %102 : i32 to index
        %104 = memref.load %arg4[%103] : memref<64xi32, #tpu.memory_space<smem>>
        %105 = vector.broadcast %104 : i32 to vector<8x32xi32>
        %106 = arith.cmpi eq, %72, %105 : vector<8x32xi32>
        %107 = vector.extract_strided_slice %71 {offsets = [5, 0], sizes = [1, 32], strides = [1, 1]} : vector<8x32xf32> to vector<1x32xf32>
        %108 = arith.index_cast %100 : i32 to index
        %c0_48 = arith.constant 0 : index
        %c0_49 = arith.constant 0 : index
        %109 = vector.load %arg17[%108, %c0_48, %c0_49] : memref<8x8x32xf32, #tpu.memory_space<vmem>>, vector<1x8x32xf32>
        %110 = vector.shape_cast %109 : vector<1x8x32xf32> to vector<8x32xf32>
        %111 = vector.shape_cast %107 : vector<1x32xf32> to vector<1x32xf32>
        %112 = vector.broadcast %111 : vector<1x32xf32> to vector<8x32xf32>
        %113 = arith.select %106, %112, %110 : vector<8x32xi1>, vector<8x32xf32>
        %114 = arith.index_cast %100 : i32 to index
        %c0_50 = arith.constant 0 : index
        %c0_51 = arith.constant 0 : index
        %115 = vector.load %arg17[%114, %c0_50, %c0_51] : memref<8x8x32xf32, #tpu.memory_space<vmem>>, vector<1x8x32xf32>
        %116 = vector.shape_cast %115 : vector<1x8x32xf32> to vector<8x32xf32>
        %117 = vector.shape_cast %113 : vector<8x32xf32> to vector<1x8x32xf32>
        tpu.vector_store %arg17[%114, %c0_50, %c0_51], %117 {strides = array<i32>} : memref<8x8x32xf32, #tpu.memory_space<vmem>>, vector<1x8x32xf32>,
      } else {
      }
      %c6_i32 = arith.constant 6 : i32
      %91 = arith.cmpi sgt, %44, %c6_i32 : i32
      %92 = arith.extui %91 : i1 to i32
      %c0_i32_43 = arith.constant 0 : i32
      %93 = arith.cmpi ne, %92, %c0_i32_43 : i32
      scf.if %93 {
        %c8_i32 = arith.constant 8 : i32
        %97 = arith.muli %arg0, %c8_i32 : i32
        %c6_i32_45 = arith.constant 6 : i32
        %98 = arith.addi %97, %c6_i32_45 : i32
        %99 = arith.index_cast %98 : i32 to index
        %100 = memref.load %arg3[%99] : memref<64xi32, #tpu.memory_space<smem>>
        %c8_i32_46 = arith.constant 8 : i32
        %101 = arith.muli %arg0, %c8_i32_46 : i32
        %c6_i32_47 = arith.constant 6 : i32
        %102 = arith.addi %101, %c6_i32_47 : i32
        %103 = arith.index_cast %102 : i32 to index
        %104 = memref.load %arg4[%103] : memref<64xi32, #tpu.memory_space<smem>>
        %105 = vector.broadcast %104 : i32 to vector<8x32xi32>
        %106 = arith.cmpi eq, %72, %105 : vector<8x32xi32>
        %107 = vector.extract_strided_slice %71 {offsets = [6, 0], sizes = [1, 32], strides = [1, 1]} : vector<8x32xf32> to vector<1x32xf32>
        %108 = arith.index_cast %100 : i32 to index
        %c0_48 = arith.constant 0 : index
        %c0_49 = arith.constant 0 : index
        %109 = vector.load %arg17[%108, %c0_48, %c0_49] : memref<8x8x32xf32, #tpu.memory_space<vmem>>, vector<1x8x32xf32>
        %110 = vector.shape_cast %109 : vector<1x8x32xf32> to vector<8x32xf32>
        %111 = vector.shape_cast %107 : vector<1x32xf32> to vector<1x32xf32>
        %112 = vector.broadcast %111 : vector<1x32xf32> to vector<8x32xf32>
        %113 = arith.select %106, %112, %110 : vector<8x32xi1>, vector<8x32xf32>
        %114 = arith.index_cast %100 : i32 to index
        %c0_50 = arith.constant 0 : index
        %c0_51 = arith.constant 0 : index
        %115 = vector.load %arg17[%114, %c0_50, %c0_51] : memref<8x8x32xf32, #tpu.memory_space<vmem>>, vector<1x8x32xf32>
        %116 = vector.shape_cast %115 : vector<1x8x32xf32> to vector<8x32xf32>
        %117 = vector.shape_cast %113 : vector<8x32xf32> to vector<1x8x32xf32>
        tpu.vector_store %arg17[%114, %c0_50, %c0_51], %117 {strides = array<i32>} : memref<8x8x32xf32, #tpu.memory_space<vmem>>, vector<1x8x32xf32>,
      } else {
      }
      %c7_i32 = arith.constant 7 : i32
      %94 = arith.cmpi sgt, %44, %c7_i32 : i32
      %95 = arith.extui %94 : i1 to i32
      %c0_i32_44 = arith.constant 0 : i32
      %96 = arith.cmpi ne, %95, %c0_i32_44 : i32
      scf.if %96 {
        %c8_i32 = arith.constant 8 : i32
        %97 = arith.muli %arg0, %c8_i32 : i32
        %c7_i32_45 = arith.constant 7 : i32
        %98 = arith.addi %97, %c7_i32_45 : i32
        %99 = arith.index_cast %98 : i32 to index
        %100 = memref.load %arg3[%99] : memref<64xi32, #tpu.memory_space<smem>>
        %c8_i32_46 = arith.constant 8 : i32
        %101 = arith.muli %arg0, %c8_i32_46 : i32
        %c7_i32_47 = arith.constant 7 : i32
        %102 = arith.addi %101, %c7_i32_47 : i32
        %103 = arith.index_cast %102 : i32 to index
        %104 = memref.load %arg4[%103] : memref<64xi32, #tpu.memory_space<smem>>
        %105 = vector.broadcast %104 : i32 to vector<8x32xi32>
        %106 = arith.cmpi eq, %72, %105 : vector<8x32xi32>
        %107 = vector.extract_strided_slice %71 {offsets = [7, 0], sizes = [1, 32], strides = [1, 1]} : vector<8x32xf32> to vector<1x32xf32>
        %108 = arith.index_cast %100 : i32 to index
        %c0_48 = arith.constant 0 : index
        %c0_49 = arith.constant 0 : index
        %109 = vector.load %arg17[%108, %c0_48, %c0_49] : memref<8x8x32xf32, #tpu.memory_space<vmem>>, vector<1x8x32xf32>
        %110 = vector.shape_cast %109 : vector<1x8x32xf32> to vector<8x32xf32>
        %111 = vector.shape_cast %107 : vector<1x32xf32> to vector<1x32xf32>
        %112 = vector.broadcast %111 : vector<1x32xf32> to vector<8x32xf32>
        %113 = arith.select %106, %112, %110 : vector<8x32xi1>, vector<8x32xf32>
        %114 = arith.index_cast %100 : i32 to index
        %c0_50 = arith.constant 0 : index
        %c0_51 = arith.constant 0 : index
        %115 = vector.load %arg17[%114, %c0_50, %c0_51] : memref<8x8x32xf32, #tpu.memory_space<vmem>>, vector<1x8x32xf32>
        %116 = vector.shape_cast %115 : vector<1x8x32xf32> to vector<8x32xf32>
        %117 = vector.shape_cast %113 : vector<8x32xf32> to vector<1x8x32xf32>
        tpu.vector_store %arg17[%114, %c0_50, %c0_51], %117 {strides = array<i32>} : memref<8x8x32xf32, #tpu.memory_space<vmem>>, vector<1x8x32xf32>,
      } else {
      }
    } else {
    }
    return
  }
  func.func @transform_0(%arg0: i32, %arg1: memref<8xi32, #tpu.memory_space<smem>>, %arg2: memref<8xi32, #tpu.memory_space<smem>>, %arg3: memref<64xi32, #tpu.memory_space<smem>>, %arg4: memref<64xi32, #tpu.memory_space<smem>>) -> (i32, i32, i32) {
    %c0_i32 = arith.constant 0 : i32
    %c0_i32_0 = arith.constant 0 : i32
    %c0_i32_1 = arith.constant 0 : i32
    return %arg0, %c0_i32, %c0_i32_0 : i32, i32, i32
  }
  func.func @transform_1(%arg0: i32, %arg1: memref<8xi32, #tpu.memory_space<smem>>, %arg2: memref<8xi32, #tpu.memory_space<smem>>, %arg3: memref<64xi32, #tpu.memory_space<smem>>, %arg4: memref<64xi32, #tpu.memory_space<smem>>) -> (i32, i32, i32) {
    %c0_i32 = arith.constant 0 : i32
    %c0_i32_0 = arith.constant 0 : i32
    %c0_i32_1 = arith.constant 0 : i32
    return %arg0, %c0_i32, %c0_i32_0 : i32, i32, i32
  }
  func.func @transform_2(%arg0: i32, %arg1: memref<8xi32, #tpu.memory_space<smem>>, %arg2: memref<8xi32, #tpu.memory_space<smem>>, %arg3: memref<64xi32, #tpu.memory_space<smem>>, %arg4: memref<64xi32, #tpu.memory_space<smem>>) -> (i32, i32, i32) {
    %c0_i32 = arith.constant 0 : i32
    %c0_i32_0 = arith.constant 0 : i32
    %c0_i32_1 = arith.constant 0 : i32
    return %arg0, %c0_i32, %c0_i32_0 : i32, i32, i32
  }
  func.func @transform_3(%arg0: i32, %arg1: memref<8xi32, #tpu.memory_space<smem>>, %arg2: memref<8xi32, #tpu.memory_space<smem>>, %arg3: memref<64xi32, #tpu.memory_space<smem>>, %arg4: memref<64xi32, #tpu.memory_space<smem>>) -> (i32, i32) {
    %c0_i32 = arith.constant 0 : i32
    %c0_i32_0 = arith.constant 0 : i32
    %c0_i32_1 = arith.constant 0 : i32
    return %c0_i32, %c0_i32_0 : i32, i32
  }
  func.func @transform_4(%arg0: i32, %arg1: memref<8xi32, #tpu.memory_space<smem>>, %arg2: memref<8xi32, #tpu.memory_space<smem>>, %arg3: memref<64xi32, #tpu.memory_space<smem>>, %arg4: memref<64xi32, #tpu.memory_space<smem>>) -> (i32, i32) {
    %c0_i32 = arith.constant 0 : i32
    %c0_i32_0 = arith.constant 0 : i32
    %c0_i32_1 = arith.constant 0 : i32
    return %c0_i32, %c0_i32_0 : i32, i32
  }
  func.func @transform_5(%arg0: i32, %arg1: memref<8xi32, #tpu.memory_space<smem>>, %arg2: memref<8xi32, #tpu.memory_space<smem>>, %arg3: memref<64xi32, #tpu.memory_space<smem>>, %arg4: memref<64xi32, #tpu.memory_space<smem>>) -> (i32, i32) {
    %c0_i32 = arith.constant 0 : i32
    %c0_i32_0 = arith.constant 0 : i32
    %c0_i32_1 = arith.constant 0 : i32
    return %c0_i32, %c0_i32_0 : i32, i32
  }
  func.func @transform_6(%arg0: i32, %arg1: memref<8xi32, #tpu.memory_space<smem>>, %arg2: memref<8xi32, #tpu.memory_space<smem>>, %arg3: memref<64xi32, #tpu.memory_space<smem>>, %arg4: memref<64xi32, #tpu.memory_space<smem>>) -> (i32, i32) {
    %c0_i32 = arith.constant 0 : i32
    %c0_i32_0 = arith.constant 0 : i32
    %c0_i32_1 = arith.constant 0 : i32
    return %c0_i32, %c0_i32_0 : i32, i32
  }
  func.func @transform_7(%arg0: i32, %arg1: memref<8xi32, #tpu.memory_space<smem>>, %arg2: memref<8xi32, #tpu.memory_space<smem>>, %arg3: memref<64xi32, #tpu.memory_space<smem>>, %arg4: memref<64xi32, #tpu.memory_space<smem>>) -> (i32, i32) {
    %c0_i32 = arith.constant 0 : i32
    %c0_i32_0 = arith.constant 0 : i32
    %c0_i32_1 = arith.constant 0 : i32
    return %c0_i32, %c0_i32_0 : i32, i32
  }
  func.func @transform_8(%arg0: i32, %arg1: memref<8xi32, #tpu.memory_space<smem>>, %arg2: memref<8xi32, #tpu.memory_space<smem>>, %arg3: memref<64xi32, #tpu.memory_space<smem>>, %arg4: memref<64xi32, #tpu.memory_space<smem>>) -> (i32, i32, i32) {
    %c0_i32 = arith.constant 0 : i32
    %c0_i32_0 = arith.constant 0 : i32
    %c0_i32_1 = arith.constant 0 : i32
    return %arg0, %c0_i32, %c0_i32_0 : i32, i32, i32
  }
  func.func @transform_9(%arg0: i32, %arg1: memref<8xi32, #tpu.memory_space<smem>>, %arg2: memref<8xi32, #tpu.memory_space<smem>>, %arg3: memref<64xi32, #tpu.memory_space<smem>>, %arg4: memref<64xi32, #tpu.memory_space<smem>>) -> (i32, i32, i32) {
    %c0_i32 = arith.constant 0 : i32
    %c0_i32_0 = arith.constant 0 : i32
    %c0_i32_1 = arith.constant 0 : i32
    return %arg0, %c0_i32, %c0_i32_0 : i32, i32, i32
  }
}

</mosaic_0001>

<bundles_post_ra>
// kernel: _lattice_forward_jit.1
= control target key start
LH: loop header
LB: loop body
LE: loop exit
PB: predicated region body
PF: predicated region fallthrough
CT: control target
= control target key end

     0   :  { %s1791_s0 = inlined_call_operand.vmem [shape: s32[8], index: 0, kind: input, shape index: {}]   ;;  %s1792_s4 = inlined_call_operand.vmem [shape: f32[8,1,96], index: 4, kind: input, shape index: {}]   ;;  %s1793_s5 = inlined_call_operand.vmem [shape: f32[8,1,32], index: 5, kind: input, shape index: {}]   ;;  %s1794_s6 = inlined_call_operand.vmem [shape: f32[8,8,96], index: 6, kind: input, shape index: {}]   ;;  %s1795_s7 = inlined_call_operand.vmem [shape: f32[1,32], index: 7, kind: input, shape index: {}]   ;;  %s1796_s8 = inlined_call_operand.vmem [shape: f32[1,32], index: 8, kind: input, shape index: {}]   ;;  %s1797_s9 = inlined_call_operand.vmem [shape: f32[32,96], index: 9, kind: input, shape index: {}]   ;;  %s1798_s10 = inlined_call_operand.vmem [shape: f32[32,32], index: 10, kind: input, shape index: {}]   ;;  %s1799_s11 = inlined_call_operand.vmem [shape: f32[32,96], index: 11, kind: input, shape index: {}]   ;;  %s1800_s12 = inlined_call_operand.hbm [shape: f32[8,1,32], index: 12, kind: output, shape index: {0}]   ;;  %s1801_s13 = inlined_call_operand.hbm [shape: f32[8,1,32], index: 13, kind: output, shape index: {1}]   ;;  %s1802_s1 = inlined_call_operand.vmem [shape: s32[8], index: 1, kind: input, shape index: {}]   ;;  %s1803_s2 = inlined_call_operand.vmem [shape: s32[64], index: 2, kind: input, shape index: {}]   ;;  %s1804_s3 = inlined_call_operand.vmem [shape: s32[64], index: 3, kind: input, shape index: {}]  }
   0x1   :  { %s19_s27 = sshll.u32 %s1791_s0, 4  ;;  %s23_s30 = sshll.u32 %s1802_s1, 4  ;;  %s20_s27 = int_to_ptr.vmem [resolvable:$true] %s19_s27  ;;  %s24_s30 = int_to_ptr.vmem [resolvable:$true] %s23_s30 }
   0x2   :  { %s1249_s14 = scalar_lea.vmem %s20_s27, 16  ;;  %p1254_p1 = scmp.lt.s32.totalorder %s20_s27, %s20_s27 }
   0x3   :  { %p1250_p0 = scmp.ne.s32.totalorder %s20_s27, %s1249_s14  ;;  %p1255_p2 = scmp.lt.s32.totalorder %s1249_s14, %s1249_s14 }
   0x5   :  { %p1256_p3 = por %p1255_p2, %p1254_p1 }
   0x7   :  { %p1257_p4 = pnand %p1256_p3, %p1250_p0 }
   0x9   :  { %1260 = shalt.err (!%p1257_p4)  }
   0xa   :  { %s1395_s15 = smov [#allocation6]   ;;  %s1261_s16 = scalar_lea.vmem %s24_s30, 16 }
   0xb   :  { %22 = dma.vmem_to_smem %s20_s27, 16, %s1395_s15, [#allocation5] }
   0xc   :  { %p1262_p5 = scmp.ne.s32.totalorder %s24_s30, %s1261_s16  ;;  %p1266_p6 = scmp.lt.s32.totalorder %s24_s30, %s24_s30 }
   0xd   :  { %p1267_p7 = scmp.lt.s32.totalorder %s1261_s16, %s1261_s16 }
   0xf   :  { %p1268_p8 = por %p1267_p7, %p1266_p6 }
  0x11   :  { %p1269_p9 = pnand %p1268_p8, %p1262_p5 }
  0x13   :  { %1272 = shalt.err (!%p1269_p9)  }
  0x14   :  { %s1396_s0 = smov [#allocation7]   ;;  %s27_s18 = sshll.u32 %s1803_s2, 4  ;;  %s28_s18 = int_to_ptr.vmem [resolvable:$true] %s27_s18 }
  0x15   :  { %26 = dma.vmem_to_smem %s24_s30, 16, %s1396_s0, [#allocation5] }
  0x16   :  { %s31_s21 = sshll.u32 %s1804_s3, 4  ;;  %s1273_s22 = scalar_lea.vmem %s28_s18, 16  ;;  %s32_s21 = int_to_ptr.vmem [resolvable:$true] %s31_s21 }
  0x17   :  { %p1274_p10 = scmp.ne.s32.totalorder %s28_s18, %s1273_s22  ;;  %p1278_p11 = scmp.lt.s32.totalorder %s28_s18, %s28_s18 }
  0x18   :  { %p1279_p12 = scmp.lt.s32.totalorder %s1273_s22, %s1273_s22 }
  0x1a   :  { %p1280_p13 = por %p1279_p12, %p1278_p11 }
  0x1c   :  { %p1281_p0 = pnand %p1280_p13, %p1274_p10 }
  0x1e   :  { %1284 = shalt.err (!%p1281_p0)  }
  0x1f   :  { %s1397_s23 = smov [#allocation8]   ;;  %s1285_s24 = scalar_lea.vmem %s32_s21, 16 }
  0x20   :  { %30 = dma.vmem_to_smem %s28_s18, 16, %s1397_s23, [#allocation5] }
  0x21   :  { %p1286_p1 = scmp.ne.s32.totalorder %s32_s21, %s1285_s24  ;;  %p1290_p2 = scmp.lt.s32.totalorder %s32_s21, %s32_s21 }
  0x22   :  { %p1291_p3 = scmp.lt.s32.totalorder %s1285_s24, %s1285_s24 }
  0x24   :  { %p1292_p4 = por %p1291_p3, %p1290_p2 }
  0x26   :  { %p1293_p5 = pnand %p1292_p4, %p1286_p1 }
  0x28   :  { %1296 = shalt.err (!%p1293_p5)  }
  0x29   :  { %s1398_s2 = smov [#allocation9]  }
  0x2a   :  { %34 = dma.vmem_to_smem %s32_s21, 16, %s1398_s2, [#allocation5] }
  0x2b   :  { %1369 = dma.done.wait [#allocation5], 64 }
  0x2c   :  { %1370 = vsyncadd [#allocation5], 4294967232 }
  0x2d   :  { %36 = sfence }
  0x2e   :  { %37 = vsyncpa [#allocation11], 0 }
  0x2f   :  { %39 = vsyncpa [#allocation11 + $0x1], 0 }
  0x30   :  { %40 = vsyncpa [#allocation13], 0 }
  0x31   :  { %42 = vsyncpa [#allocation13 + $0x1], 0  ;;  %s1497_s3 = smov 0   ;;  %s1499_s25 = smov 0  }
  0x32   :  { %s1501_s26 = smov 0   ;;  %s1503_s27 = smov 0  }
  0x33 LB: > { %1807 = sst [smem:[#allocation17_spill]] %s1385_s25  ;;  %s1518_s28 = sadd.s32 4294967295, %s1393_s27   ;;  %s1393_s27 = sphi %s1503_s27, %s1818_s27   ;;  %s1389_s26 = sphi %s1501_s26, %s1817_s26   ;;  %s1385_s25 = sphi %s1499_s25, %s1816_s25   ;;  %s1381_s3 = sphi %s1497_s3, %s1815_s3  }
  0x34   : > { %1808 = sst [smem:[#allocation18_spill]] %s1389_s26  ;;  %s1061_s29 = sadd.s32 4294967294, %s1393_s27  }
  0x35   : > { %s1522_s30 = sadd.s32 1, %s1393_s27   ;;  %s238_s14 = sadd.s32 1, %s1389_s26 }
  0x36   : > { %s235_s15 = ssub.s32 %s1393_s27, %s1522_s30  ;;  %p248_p6 = scmp.ne.s32.totalorder %s1389_s26, %s1385_s25 }
  0x37   : > { %p236_p7 = scmp.eq.s32.totalorder %s235_s15, 0  ;;  %p249_p8 = scmp.eq.s32.totalorder %s1518_s28, 7 }
  0x38   : > { %p254_p9 = scmp.ne.s32.totalorder %s1385_s25, %s1381_s3  ;;  %p255_p10 = scmp.eq.s32.totalorder %s1061_s29, 7 }
  0x39   : > { %s1533_s16 = scalar_select %p236_p7, %s1389_s26, %s238_s14  }
  0x3a   : > { %p1535_p11 = por %p249_p8, %p248_p6  ;;  %p1539_p12 = por %p255_p10, %p254_p9 }
  0x3b   : > { %1809 = sst [smem:[#allocation19_spill]] %s1533_s16  ;;  %p1064_p13 = scmp.ge.s32.totalorder %s1393_s27, 1 }
  0x3c   : > { %p333_p0 = scmp.lt.s32.totalorder %s1393_s27, 9 }
  0x3e   : > { %p334_p1 = pnand %p1064_p13, %p333_p0 }
  0x3f   : > { %s1546_s17 = sand.u32 (!%p334_p1), 1, %s1385_s25   ;;  %p377_p2 = scmp.lt.s32.totalorder (!%p334_p1), %s1518_s28, 7 }
  0x40   : > { %337 = sbr.rel (%p334_p1) target bundleno = 1455 (0x5af), region = 52  ;;  %s370_s16 = scalar_lea.vmem (!%p334_p1), [#allocation10], %s1546_s17 }
  0x41   : > { %s376_s26 = scalar_lea.vmem (!%p334_p1), [#allocation12], %s1546_s17  ;;  %p1066_p3 = scmp.ne.s32.totalorder (!%p334_p1), %s1518_s28, 0 }
  0x47   : > { %s1550_s18 = scalar_select %p377_p2, %s1518_s28, 7 }
  0x48   : > { %390 = sbr.rel (%p1066_p3) target bundleno = 79 (0x4f), region = 56  ;;  %v391_v0 = vld [vmem:[%s1795_s7] sm:$0x1] (!%p1066_p3)  ;;  %vm392_vm0 = vcmask (!%p1066_p3), 253952   ;;  %vm396_vm1 = vcmask (!%p1066_p3), 261120   ;;  %v1399_v2 = vmov (!%p1066_p3), 0.0  }
  0x49   : > { %s382_s24 = scalar_lea.vmem %s1793_s5, %s1550_s18  ;;  %s1065_s2 = sshll.u32 %s1550_s18, 3  ;;  %v394_v1 = vld [vmem:[%s1796_s8] sm:$0x1] (!%p1066_p3)  ;;  %393 = vst.msk [vmem:[#allocation2] sm:$0x1] (!%p1066_p3), %vm392_vm0, %v391_v0 }
  0x4a   : > { %s1564_s15 = scalar_lea.vmem %s1794_s6, %s1065_s2  ;;  %395 = vst.msk [vmem:[#allocation3] sm:$0x1] (!%p1066_p3), %vm392_vm0, %v394_v1 }
  0x4b   : > { %397 = vst.msk [vmem:[#allocation4] sm:$0xff] (!%p1066_p3), %vm396_vm1, %v1399_v2  ;;  %398 = vst.msk [vmem:[#allocation4 + $0x8] sm:$0xff] (!%p1066_p3), %vm396_vm1, %v1399_v2 }
  0x4c   : > { %399 = vst.msk [vmem:[#allocation4 + $0x10] sm:$0xff] (!%p1066_p3), %vm396_vm1, %v1399_v2  ;;  %400 = vst.msk [vmem:[#allocation4 + $0x18] sm:$0xff] (!%p1066_p3), %vm396_vm1, %v1399_v2 }
  0x4d   : > { %401 = vst.msk [vmem:[#allocation4 + $0x20] sm:$0xff] (!%p1066_p3), %vm396_vm1, %v1399_v2  ;;  %402 = vst.msk [vmem:[#allocation4 + $0x28] sm:$0xff] (!%p1066_p3), %vm396_vm1, %v1399_v2 }
  0x4e   : > { %403 = vst.msk [vmem:[#allocation4 + $0x30] sm:$0xff] (!%p1066_p3), %vm396_vm1, %v1399_v2  ;;  %404 = vst.msk [vmem:[#allocation4 + $0x38] sm:$0xff] (!%p1066_p3), %vm396_vm1, %v1399_v2 }
  0x4f PF: > { %s1576_s25 = sld [smem:[#allocation6 + %s1518_s28]]  ;;  %v409_v3 = vld [vmem:[%s1797_s9] sm:$0xff]  ;;  %v410_v4 = vld [vmem:[%s1797_s9 + $0x8] sm:$0xff]  ;;  %v411_v5 = vld [vmem:[%s1797_s9 + $0x10] sm:$0xff]  ;;  %v1400_v6 = vmov 0.0|0.0   ;;  %vm1401_vm2 = vmmov 0   ;;  %s1812_s21 = scalar_lea.vmem %s1792_s4, %s1550_s18 }
  0x50   : > { %1145 = vmatprep.subr.bf16.mxu0 %v1400_v6  ;;  %v1146_v7 = vpack.c.bf16 %v410_v4, %v409_v3  ;;  %v412_v8 = vld [vmem:[%s1797_s9 + $0x18] sm:$0xff]  ;;  %v1402_v9 = vmov 0.0   ;;  %v405_v11 = vld [vmem:[#allocation2] sm:$0x1]  ;;  %vm413_vm3 = vcmask 261120   ;;  %s1403_s2 = smov 64  }
  0x51   : > { %1120 = vmatprep.mubr.msk.f32.mxu0 %vm1401_vm2, %v1402_v9  ;;  %v1149_v10 = vpack.c.bf16 %v412_v8, %v411_v5  ;;  %v408_v12 = vld [vmem:[%s1812_s21] sm:$0x1]  ;;  %v406_v22 = vld [vmem:[#allocation3] sm:$0x1]  ;;  %vm503_vm4 = vcmask 253952  }
  0x52   : > { %1147 = vmatpush3.bf16.msra.mxu0 %v1146_v7 }
  0x53   : > { %1148 = vmatprep.subr.bf16.mxu0 %v1400_v6 }
  0x55   : > { %p1069_p4 = scmp.le.s32.totalorder %s1576_s25, 0 }
  0x56   : > { %1150 = vmatpush3.bf16.msra.mxu0 %v1149_v10  ;;  %v512_v27 = vld [vmem:[%s1798_s10] sm:$0xff] (!%p1069_p4)  ;;  %v513_v28 = vld [vmem:[%s1798_s10 + $0x8] sm:$0xff] (!%p1069_p4)  ;;  %v514_v29 = vld [vmem:[%s1798_s10 + $0x10] sm:$0xff] (!%p1069_p4)  ;;  %v1404_v30 = vmov (!%p1069_p4), 0.0|0.0   ;;  %vm1405_vm5 = vmmov (!%p1069_p4), 0   ;;  %v1406_v33 = vmov (!%p1069_p4), 0.0   ;;  %v603_v45 = vlaneseq (!%p1069_p4) }
  0x57   : > { %1151 = vmatprep.subr.bf16.mxu0 (!%p1069_p4), %v1404_v30  ;;  %v1152_v31 = vpack.c.bf16 (!%p1069_p4), %v513_v28, %v512_v27  ;;  %v515_v32 = vld [vmem:[%s1798_s10 + $0x18] sm:$0xff] (!%p1069_p4)  ;;  %s1070_s29 = sshll.u32 (!%p1069_p4), %s1518_s28, 3  ;;  %v1072_v36 = vld [vmem:[%s382_s24] ss:$0 sm:$0xff] (!%p1069_p4)  ;;  %v605_v47 = vstv (!%p1069_p4), %s1576_s25 }
  0x58   : > { %v1155_v34 = vpack.c.bf16 (!%p1069_p4), %v515_v32, %v514_v29  ;;  %s510_s14 = scalar_lea.vmem (!%p1069_p4), [#allocation4], %s1070_s29  ;;  %v604_v46 = vshrl.u32 (!%p1069_p4), %v603_v45, 7 }
  0x59   : > { %1121 = vmatmul.mubr.msk.f32.vlgmr.msra.gmra.mrb[0].mxu0 %vm413_vm3, %v405_v11  ;;  %v511_v35 = vld [vmem:[%s510_s14] sm:$0xff] (!%p1069_p4) }
  0x5a   : > { %1131 = vmatprep.mubr.msk.f32.mxu0 (!%p1069_p4), %vm1405_vm5, %v1406_v33  ;;  %1153 = vmatpush3.bf16.msra.mxu0 (!%p1069_p4), %v1152_v31  ;;  %vm1625_vm6 = vcmp.lt.s32.totalorder (!%p1069_p4), %v604_v46, %v605_v47  ;;  %v627_v61 = vsub.s32 (!%p1069_p4), 0, %v604_v46 }
  0x5b   : > { %1154 = vmatprep.subr.bf16.mxu0 (!%p1069_p4), %v1404_v30  ;;  %v621_v0 = vsel (!%p1069_p4), %vm1625_vm6, %v511_v35, 0.0 }
  0x5e   : > { %1156 = vmatpush3.bf16.msra.mxu0 (!%p1069_p4), %v1155_v34 }
 0x12c   : > { %v483_v13 = vpop.f32.mrb[0].mxu0 }
 0x12d   : > { %v487_v14 = vadd.f32 %v483_v13, %v408_v12  ;;  %v1122_v15 = vpop.f32.mrb[1].mxu0  ;;  %1132 = vmatmul.mubr.msk.f32.vlgmr.msra.gmra.mrb[0].mxu0 (!%p1069_p4), %vm413_vm3, %v511_v35 }
 0x12f   : > { %1225 = vtanh.f32 %v487_v14  ;;  %v1068_v17 = vmul.f32 -1.442695, %v487_v14 }
 0x131   : > { %1227 = vpow2.f32 %v1068_v17 }
 0x139   : > { %v1226_v16 = vpop.eup %1225 }
 0x13a   : > { %498 = vrot.lane.b32.xlu0 %v1226_v16, %s1403_s2 }
 0x13b   : > { %v1228_v18 = vpop.eup %1227 }
 0x13c   : > { %v491_v19 = vadd.f32 1.0, %v1228_v18 }
 0x13e   : > { %1229 = vrcp.f32 %v491_v19 }
 0x148   : > { %v1596_v20 = vpop.eup %1229 }
 0x149   : > { %v495_v21 = vsub.f32 1.0, %v1596_v20  ;;  %v607_v49 = vmul.f32 (!%p1069_p4), 1.442695, %v1596_v20 }
 0x14b   : > { %v496_v24 = vmul.f32 %v495_v21, %v406_v22 }
 0x1ab   : > { %508 = sbr.rel (%p1069_p4) target bundleno = 603 (0x25b), region = 60 }
 0x1ac   : > { %v1599_v23 = vpop.permute.xlu0 %498 }
 0x1ad   : > { %v501_v25 = vmul.f32 %v1596_v20, %v1599_v23 }
 0x1af   : > { %v502_v26 = vadd.f32 %v501_v25, %v496_v24 }
 0x1b1   : > { %504 = vst.msk [vmem:[#allocation3] sm:$0x1] %vm503_vm4, %v502_v26 }
 0x200   : > { %v585_v37 = vpop.f32.mrb[0].mxu0 }
 0x201   : > { %v596_v38 = vadd.f32 %v1072_v36, %v585_v37  ;;  %v1133_v39 = vpop.f32.mrb[1].mxu0 }
 0x203   : > { %v1073_v40 = vmul.f32 -1.442695, %v596_v38 }
 0x205   : > { %1231 = vpow2.f32 %v1073_v40 }
 0x20f   : > { %v1232_v41 = vpop.eup %1231 }
 0x210   : > { %v600_v42 = vadd.f32 1.0, %v1232_v41 }
 0x212   : > { %1233 = vrcp.f32 %v600_v42 }
 0x21c   : > { %v1234_v43 = vpop.eup %1233 }
 0x21d   : > { %v609_v44 = vmul.f32 1.442695, %v1234_v43 }
 0x21f   : > { %1235 = vpow2.f32 %v609_v44 }
 0x220   : > { %1237 = vpow2.f32 %v607_v49 }
 0x229   : > { %v1236_v50 = vpop.eup %1235 }
 0x22a   : > { %v611_v51 = vsel %vm1625_vm6, %v1236_v50, 0.0  ;;  %v1238_v58 = vpop.eup %1237 }
 0x22b   : > { %v612_v52 = vsel %vm413_vm3, %v611_v51, 0.0 }
 0x22c   : > { %v613_v53 = vrot.slane %v612_v52, 4 }
 0x22e   : > { %v614_v54 = vadd.f32 %v613_v53, %v612_v52 }
 0x230   : > { %v615_v55 = vrot.slane %v614_v54, 2 }
 0x232   : > { %v616_v56 = vadd.f32 %v615_v55, %v614_v54 }
 0x234   : > { %v617_v57 = vrot.slane %v616_v56, 1 }
 0x236   : > { %v618_v59 = vadd.f32 %v617_v57, %v616_v56 }
 0x238   : > { %v619_v60 = vadd.f32 %v1238_v58, %v618_v59 }
 0x23a   : > { %1239 = vrcp.f32 %v619_v60 }
 0x244   : > { %v1240_v62 = vpop.eup %1239 }
 0x245   : > { %v628_v63 = vrot.slane %v1240_v62, %v627_v61  ;;  %v622_v7 = vmul.f32 %v1240_v62, %v1238_v58 }
 0x247   : > { %v630_v1 = vmul.f32 %v628_v63, %v611_v51  ;;  %v623_v10 = vmul.f32 %v622_v7, %v1599_v23 }
 0x249   : > { %v631_v2 = vmul.f32 %v630_v1, %v621_v0 }
 0x24b   : > { %v632_v3 = vsel %vm413_vm3, %v631_v2, 0.0 }
 0x24c   : > { %v633_v4 = vrot.slane %v632_v3, 4 }
 0x24e   : > { %v634_v5 = vadd.f32 %v633_v4, %v632_v3 }
 0x250   : > { %v635_v6 = vrot.slane %v634_v5, 2 }
 0x252   : > { %v636_v8 = vadd.f32 %v635_v6, %v634_v5 }
 0x254   : > { %v637_v9 = vrot.slane %v636_v8, 1 }
 0x256   : > { %v638_v11 = vadd.f32 %v637_v9, %v636_v8 }
 0x258   : > { %v639_v12 = vadd.f32 %v638_v11, %v623_v10 }
 0x25a   : > { %640 = vst.msk [vmem:[#allocation3] sm:$0x1] %vm503_vm4, %v639_v12 }
 0x25b PF: > { %s1407_s18 = smov 32   ;;  %v649_v15 = vlaneseq  ;;  %s1642_s24 = sld [smem:[#allocation7 + %s1518_s28]] }
 0x25c   : > { %s1408_s25 = smov 96  }
 0x25d   : > { %v1644_v16 = vshrl.u32 %v649_v15, 7 }
 0x25f   : > { %v651_v17 = vsub.s32 0, %v1644_v16 }
 0x261   : > { %v641_v13 = vld [vmem:[#allocation3] sm:$0x1]  ;;  %p1074_p5 = scmp.le.s32.totalorder %s1642_s24, 0 }
 0x262   : > { %1241 = vtanh.f32 %v641_v13  ;;  %658 = vst.msk [vmem:[%s376_s26] sm:$0x1] %vm503_vm4, %v641_v13  ;;  %v665_v23 = vld [vmem:[%s1799_s11] sm:$0xff] (!%p1074_p5)  ;;  %v667_v24 = vld [vmem:[%s1799_s11 + $0x10] sm:$0xff] (!%p1074_p5)  ;;  %v1409_v25 = vmov (!%p1074_p5), 0.0|0.0   ;;  %v668_v27 = vld [vmem:[%s1799_s11 + $0x18] sm:$0xff] (!%p1074_p5)  ;;  %v757_v42 = vrot.slane (!%p1074_p5), %v641_v13, %v651_v17 }
 0x263   : > { %1157 = vmatprep.subr.bf16.mxu0 (!%p1074_p5), %v1409_v25  ;;  %vm1410_vm7 = vmmov (!%p1074_p5), 0   ;;  %v1411_v28 = vmov (!%p1074_p5), 0.0   ;;  %v1161_v29 = vpack.c.bf16 (!%p1074_p5), %v668_v27, %v667_v24  ;;  %v664_v30 = vld [vmem:[%s1564_s15] sm:$0xff] (!%p1074_p5)  ;;  %p1079_p6 = scmp.le.s32.totalorder (!%p1074_p5), %s1642_s24, 1 }
 0x264   : > { %1142 = vmatprep.mubr.msk.f32.mxu0 (!%p1074_p5), %vm1410_vm7, %v1411_v28 }
 0x26c   : > { %v1242_v14 = vpop.eup %1241 }
 0x26d   : > { %644 = vrot.lane.b32.xlu0 %v1242_v14, %s1407_s18  ;;  %s1412_s18 = smov (!%p1074_p5), 96  }
 0x2df   : > { %v645_v18 = vpop.permute.xlu0 %644 }
 0x2e0   : > { %v647_v19 = vmul.f32 %v1596_v20, %v645_v18  ;;  %v666_v20 = vld [vmem:[%s1799_s11 + $0x8] sm:$0xff] (!%p1074_p5) }
 0x2e1   : > { %v1158_v26 = vpack.c.bf16 (!%p1074_p5), %v666_v20, %v665_v23 }
 0x2e2   : > { %v652_v21 = vrot.slane %v647_v19, %v651_v17 }
 0x2e3   : > { %1159 = vmatpush3.bf16.msra.mxu0 (!%p1074_p5), %v1158_v26 }
 0x2e4   : > { %653 = vrot.lane.b32.xlu0 %v652_v21, %s1408_s25  ;;  %1160 = vmatprep.subr.bf16.mxu0 (!%p1074_p5), %v1409_v25  ;;  %s1668_s25 = sshll.u32 (!%p1074_p5), %s1518_s28, 3 }
 0x2e5   : > { %s773_s15 = sld [smem:[#allocation8 + %s1668_s25]] (!%p1074_p5) }
 0x2e6   : > { %s774_s22 = sld [smem:[#allocation9 + %s1668_s25]] (!%p1074_p5) }
 0x2e7   : > { %1162 = vmatpush3.bf16.msra.mxu0 (!%p1074_p5), %v1161_v29 }
 0x2eb   : > { %s1078_s23 = sshll.u32 (!%p1074_p5), %s773_s15, 3 }
 0x2ec   : > { %v775_v43 = vstv (!%p1074_p5), %s774_s22  ;;  %s778_s21 = scalar_lea.vmem (!%p1074_p5), [#allocation4], %s1078_s23 }
 0x2ed   : > { %vm776_vm8 = vcmp.eq.s32.totalorder (!%p1074_p5), %v1644_v16, %v775_v43  ;;  %v779_v47 = vld [vmem:[%s778_s21] sm:$0xff] (!%p1074_p5) }
 0x351   : > { %663 = sbr.rel (%p1074_p5) target bundleno = 1407 (0x57f), region = 64 }
 0x356   : > { %v654_v22 = vpop.permute.xlu0 %653 }
 0x357   : > { %656 = vst.msk [vmem:[#allocation2] sm:$0x1] %vm503_vm4, %v654_v22  ;;  %657 = vst.msk [vmem:[%s370_s16] sm:$0x1] %vm503_vm4, %v654_v22  ;;  %1143 = vmatmul.mubr.msk.f32.vlgmr.msra.gmra.mrb[0].mxu0 (!%p1074_p5), %vm413_vm3, %v654_v22 }
 0x358   : > { %s790_s2 = sadd.s32 (!%p1079_p6), 1, %s1668_s25  ;;  %v800_v50 = vsub.s32 (!%p1079_p6), 1, %v1644_v16 }
 0x359   : > { %s791_s29 = sld [smem:[#allocation8 + %s790_s2]] (!%p1079_p6) }
 0x35a   : > { %s792_s14 = sld [smem:[#allocation9 + %s790_s2]] (!%p1079_p6) }
 0x35f   : > { %s1080_s19 = sshll.u32 (!%p1079_p6), %s791_s29, 3 }
 0x360   : > { %v793_v52 = vstv (!%p1079_p6), %s792_s14  ;;  %s796_s20 = scalar_lea.vmem (!%p1079_p6), [#allocation4], %s1080_s19 }
 0x361   : > { %vm794_vm9 = vcmp.eq.s32.totalorder (!%p1079_p6), %v1644_v16, %v793_v52 }
 0x42a   : > { %v737_v31 = vpop.f32.mrb[0].mxu0 }
 0x42b   : > { %v744_v32 = vrot.slane %v737_v31, %v651_v17  ;;  %v1144_v33 = vpop.f32.mrb[1].mxu0 }
 0x42d   : > { %v745_v34 = vadd.f32 %v744_v32, %v664_v30 }
 0x42f   : > { %1243 = vtanh.f32 %v745_v34  ;;  %v1076_v36 = vmul.f32 -1.442695, %v745_v34 }
 0x431   : > { %1245 = vpow2.f32 %v1076_v36 }
 0x439   : > { %v1244_v35 = vpop.eup %1243 }
 0x43a   : > { %761 = vrot.lane.b32.xlu0 %v1244_v35, %s1412_s18 }
 0x43b   : > { %v1246_v37 = vpop.eup %1245 }
 0x43c   : > { %v749_v38 = vadd.f32 1.0, %v1246_v37 }
 0x43e   : > { %1247 = vrcp.f32 %v749_v38 }
 0x448   : > { %v1248_v39 = vpop.eup %1247 }
 0x449   : > { %v759_v44 = vmul.f32 %v1248_v39, %v757_v42 }
 0x4ac   : > { %v762_v40 = vpop.permute.xlu0 %761 }
 0x4ad   : > { %v764_v41 = vmul.f32 %v1248_v39, %v762_v40 }
 0x4af   : > { %766 = vrot.lane.b32.xlu0 %v764_v41, %s1412_s18 }
 0x521   : > { %v767_v45 = vpop.permute.xlu0 %766  ;;  %789 = sbr.rel (%p1079_p6) target bundleno = 1329 (0x531), region = 68 }
 0x522   : > { %v1672_v46 = vadd.f32 %v767_v45, %v759_v44 }
 0x524   : > { %v783_v48 = vrot.slane %v1672_v46, %v651_v17  ;;  %v801_v51 = vrot.slane (!%p1079_p6), %v1672_v46, %v800_v50 }
 0x526   : > { %v784_v49 = vsel %vm776_vm8, %v783_v48, %v779_v47 }
 0x527   : > { %785 = vst.msk [vmem:[%s778_s21] sm:$0xff] %vm413_vm3, %v784_v49 }
 0x52e   : > { %v797_v53 = vld [vmem:[%s796_s20] sm:$0xff] }
 0x52f   : > { %v802_v54 = vsel %vm794_vm9, %v801_v51, %v797_v53 }
 0x530   : > { %803 = vst.msk [vmem:[%s796_s20] sm:$0xff] %vm413_vm3, %v802_v54 }
 0x531 PF: > { %p1081_p7 = scmp.le.s32.totalorder %s1642_s24, 2 }
 0x532   : > { %s808_s18 = sadd.s32 (!%p1081_p7), 2, %s1668_s25  ;;  %v818_v55 = vsub.s32 (!%p1081_p7), 2, %v1644_v16 }
 0x533   : > { %807 = sbr.rel (%p1081_p7) target bundleno = 1342 (0x53e), region = 72  ;;  %s809_s15 = sld [smem:[#allocation8 + %s808_s18]] (!%p1081_p7) }
 0x534   : > { %s810_s22 = sld [smem:[#allocation9 + %s808_s18]] (!%p1081_p7)  ;;  %v819_v56 = vrot.slane (!%p1081_p7), %v1672_v46, %v818_v55 }
 0x539   : > { %s1082_s23 = sshll.u32 (!%p1081_p7), %s809_s15, 3 }
 0x53a   : > { %v811_v57 = vstv %s810_s22  ;;  %s814_s21 = scalar_lea.vmem [#allocation4], %s1082_s23 }
 0x53b   : > { %vm812_vm10 = vcmp.eq.s32.totalorder %v1644_v16, %v811_v57  ;;  %v815_v58 = vld [vmem:[%s814_s21] sm:$0xff] }
 0x53c   : > { %v820_v59 = vsel %vm812_vm10, %v819_v56, %v815_v58 }
 0x53d   : > { %821 = vst.msk [vmem:[%s814_s21] sm:$0xff] %vm413_vm3, %v820_v59 }
 0x53e PF: > { %p1083_p8 = scmp.le.s32.totalorder %s1642_s24, 3 }
 0x53f   : > { %s826_s2 = sadd.s32 (!%p1083_p8), 3, %s1668_s25  ;;  %v836_v60 = vsub.s32 (!%p1083_p8), 3, %v1644_v16 }
 0x540   : > { %825 = sbr.rel (%p1083_p8) target bundleno = 1355 (0x54b), region = 76  ;;  %s827_s29 = sld [smem:[#allocation8 + %s826_s2]] (!%p1083_p8) }
 0x541   : > { %s828_s14 = sld [smem:[#allocation9 + %s826_s2]] (!%p1083_p8)  ;;  %v837_v61 = vrot.slane (!%p1083_p8), %v1672_v46, %v836_v60 }
 0x546   : > { %s1084_s19 = sshll.u32 (!%p1083_p8), %s827_s29, 3 }
 0x547   : > { %v829_v62 = vstv %s828_s14  ;;  %s832_s20 = scalar_lea.vmem [#allocation4], %s1084_s19 }
 0x548   : > { %vm830_vm11 = vcmp.eq.s32.totalorder %v1644_v16, %v829_v62  ;;  %v833_v63 = vld [vmem:[%s832_s20] sm:$0xff] }
 0x549   : > { %v838_v0 = vsel %vm830_vm11, %v837_v61, %v833_v63 }
 0x54a   : > { %839 = vst.msk [vmem:[%s832_s20] sm:$0xff] %vm413_vm3, %v838_v0 }
 0x54b PF: > { %p1085_p9 = scmp.le.s32.totalorder %s1642_s24, 4 }
 0x54c   : > { %s844_s18 = sadd.s32 (!%p1085_p9), 4, %s1668_s25  ;;  %v854_v1 = vsub.s32 (!%p1085_p9), 4, %v1644_v16 }
 0x54d   : > { %843 = sbr.rel (%p1085_p9) target bundleno = 1368 (0x558), region = 80  ;;  %s845_s15 = sld [smem:[#allocation8 + %s844_s18]] (!%p1085_p9) }
 0x54e   : > { %s846_s22 = sld [smem:[#allocation9 + %s844_s18]] (!%p1085_p9)  ;;  %v855_v2 = vrot.slane (!%p1085_p9), %v1672_v46, %v854_v1 }
 0x553   : > { %s1086_s23 = sshll.u32 (!%p1085_p9), %s845_s15, 3 }
 0x554   : > { %v847_v3 = vstv %s846_s22  ;;  %s850_s21 = scalar_lea.vmem [#allocation4], %s1086_s23 }
 0x555   : > { %vm848_vm12 = vcmp.eq.s32.totalorder %v1644_v16, %v847_v3  ;;  %v851_v4 = vld [vmem:[%s850_s21] sm:$0xff] }
 0x556   : > { %v856_v5 = vsel %vm848_vm12, %v855_v2, %v851_v4 }
 0x557   : > { %857 = vst.msk [vmem:[%s850_s21] sm:$0xff] %vm413_vm3, %v856_v5 }
 0x558 PF: > { %p1087_p10 = scmp.le.s32.totalorder %s1642_s24, 5 }
 0x559   : > { %s862_s2 = sadd.s32 (!%p1087_p10), 5, %s1668_s25  ;;  %v872_v6 = vsub.s32 (!%p1087_p10), 5, %v1644_v16 }
 0x55a   : > { %861 = sbr.rel (%p1087_p10) target bundleno = 1381 (0x565), region = 84  ;;  %s863_s29 = sld [smem:[#allocation8 + %s862_s2]] (!%p1087_p10) }
 0x55b   : > { %s864_s14 = sld [smem:[#allocation9 + %s862_s2]] (!%p1087_p10)  ;;  %v873_v7 = vrot.slane (!%p1087_p10), %v1672_v46, %v872_v6 }
 0x560   : > { %s1088_s19 = sshll.u32 (!%p1087_p10), %s863_s29, 3 }
 0x561   : > { %v865_v8 = vstv %s864_s14  ;;  %s868_s20 = scalar_lea.vmem [#allocation4], %s1088_s19 }
 0x562   : > { %vm866_vm13 = vcmp.eq.s32.totalorder %v1644_v16, %v865_v8  ;;  %v869_v9 = vld [vmem:[%s868_s20] sm:$0xff] }
 0x563   : > { %v874_v10 = vsel %vm866_vm13, %v873_v7, %v869_v9 }
 0x564   : > { %875 = vst.msk [vmem:[%s868_s20] sm:$0xff] %vm413_vm3, %v874_v10 }
 0x565 PF: > { %p1089_p13 = scmp.le.s32.totalorder %s1642_s24, 6 }
 0x566   : > { %s880_s18 = sadd.s32 (!%p1089_p13), 6, %s1668_s25  ;;  %v890_v11 = vsub.s32 (!%p1089_p13), 6, %v1644_v16 }
 0x567   : > { %879 = sbr.rel (%p1089_p13) target bundleno = 1394 (0x572), region = 88  ;;  %s881_s15 = sld [smem:[#allocation8 + %s880_s18]] (!%p1089_p13) }
 0x568   : > { %s882_s22 = sld [smem:[#allocation9 + %s880_s18]] (!%p1089_p13)  ;;  %v891_v12 = vrot.slane (!%p1089_p13), %v1672_v46, %v890_v11 }
 0x56d   : > { %s1090_s23 = sshll.u32 (!%p1089_p13), %s881_s15, 3 }
 0x56e   : > { %v883_v13 = vstv %s882_s22  ;;  %s886_s21 = scalar_lea.vmem [#allocation4], %s1090_s23 }
 0x56f   : > { %vm884_vm14 = vcmp.eq.s32.totalorder %v1644_v16, %v883_v13  ;;  %v887_v14 = vld [vmem:[%s886_s21] sm:$0xff] }
 0x570   : > { %v892_v15 = vsel %vm884_vm14, %v891_v12, %v887_v14 }
 0x571   : > { %893 = vst.msk [vmem:[%s886_s21] sm:$0xff] %vm413_vm3, %v892_v15 }
 0x572 PF: > { %p1091_p0 = scmp.le.s32.totalorder %s1642_s24, 7 }
 0x573   : > { %s898_s2 = sadd.s32 (!%p1091_p0), 7, %s1668_s25  ;;  %v908_v17 = vsub.s32 (!%p1091_p0), 7, %v1644_v16 }
 0x574   : > { %897 = sbr.rel (%p1091_p0) target bundleno = 1407 (0x57f), region = 92  ;;  %s899_s29 = sld [smem:[#allocation8 + %s898_s2]] (!%p1091_p0) }
 0x575   : > { %s900_s14 = sld [smem:[#allocation9 + %s898_s2]] (!%p1091_p0)  ;;  %v909_v18 = vrot.slane (!%p1091_p0), %v1672_v46, %v908_v17 }
 0x57a   : > { %s1092_s19 = sshll.u32 (!%p1091_p0), %s899_s29, 3 }
 0x57b   : > { %v901_v19 = vstv %s900_s14  ;;  %s904_s20 = scalar_lea.vmem [#allocation4], %s1092_s19 }
 0x57c   : > { %vm902_vm15 = vcmp.eq.s32.totalorder %v1644_v16, %v901_v19  ;;  %v905_v21 = vld [vmem:[%s904_s20] sm:$0xff] }
 0x57d   : > { %v910_v22 = vsel %vm902_vm15, %v909_v18, %v905_v21 }
 0x57e   : > { %911 = vst.msk [vmem:[%s904_s20] sm:$0xff] %vm413_vm3, %v910_v22 }
 0x57f PF: > { %s1093_s24 = sshll.u32 %s1518_s28, 4  ;;  %s929_s22 = sshll.u32 %s370_s16, 4  ;;  %s930_s22 = int_to_ptr.vmem [resolvable:$true] %s929_s22 }
 0x580   : > { %s1725_s15 = scalar_lea.hbm %s1800_s12, %s1093_s24  ;;  %s913_s23 = scalar_lea.sflag [#allocation11], %s1546_s17 }
 0x581   : > { %s1297_s21 = scalar_lea.vmem %s930_s22, 16  ;;  %s1413_s2 = smov [#allocation10]  }
 0x582   : > { %p1298_p1 = scmp.ne.s32.totalorder %s930_s22, %s1297_s21  ;;  %s1301_s29 = sshll.u32 %s1413_s2, 4  ;;  %s1302_s29 = int_to_ptr.vmem [resolvable:$false] %s1301_s29 }
 0x583   : > { %s1303_s14 = scalar_lea.vmem %s1302_s29, 32  ;;  %p1304_p4 = scmp.lt.s32.totalorder %s930_s22, %s1302_s29 }
 0x584   : > { %p1299_p2 = pnand %p1298_p1, %p1535_p11  ;;  %p1305_p5 = scmp.lt.s32.totalorder %s1303_s14, %s1297_s21 }
 0x586   : > { %p1300_p3 = pneg %p1299_p2  ;;  %p1306_p6 = por %p1305_p5, %p1304_p4 }
 0x588   : > { %p1307_p7 = pnand %p1306_p6, %p1300_p3 }
 0x58a   : > { %1310 = shalt.err (!%p1307_p7)
}
 0x58b   : > { %s1311_s16 = scalar_lea.hbm %s1725_s15, 16  ;;  %s1315_s25 = scalar_lea.hbm %s1800_s12, 128 }
 0x58c   : > { %p1312_p8 = scmp.ne.s32.totalorder %s1725_s15, %s1311_s16  ;;  %p1316_p13 = scmp.lt.u32.totalorder %s1725_s15, %s1800_s12 }
 0x58d   : > { %p1317_p0 = scmp.lt.u32.totalorder %s1315_s25, %s1311_s16  ;;  %p1319_p2 = scmp.lt.u32.totalorder %s1311_s16, %s1725_s15 }
 0x58e   : > { %p1313_p9 = pnand %p1312_p8, %p1535_p11 }
 0x58f   : > { %p1318_p1 = por %p1317_p0, %p1316_p13 }
 0x590   : > { %p1314_p10 = pneg %p1313_p9 }
 0x591   : > { %p1320_p3 = por %p1319_p2, %p1318_p1 }
 0x593   : > { %p1321_p4 = pnand %p1320_p3, %p1314_p10 }
 0x595   : > { %1324 = shalt.err (!%p1321_p4)
}
 0x596   : > { %1163 = dma.vmem_to_hbm [thread:$0]  (%p1535_p11), %s930_s22, 16, %s1725_s15, %s913_s23  }
 0x597   : > { %s1752_s14 = scalar_lea.hbm %s1801_s13, %s1093_s24  ;;  %s942_s19 = sshll.u32 %s376_s26, 4  ;;  %s943_s19 = int_to_ptr.vmem [resolvable:$true] %s942_s19 }
 0x598   : > { %s917_s16 = scalar_lea.sflag [#allocation13], %s1546_s17  ;;  %s1325_s20 = scalar_lea.vmem %s943_s19, 16 }
 0x599   : > { %p1326_p5 = scmp.ne.s32.totalorder %s943_s19, %s1325_s20  ;;  %s1414_s25 = smov [#allocation12]  }
 0x59a   : > { %s1329_s18 = sshll.u32 %s1414_s25, 4  ;;  %s1330_s18 = int_to_ptr.vmem [resolvable:$false] %s1329_s18 }
 0x59b   : > { %p1327_p6 = pnand %p1326_p5, %p1535_p11  ;;  %s1331_s2 = scalar_lea.vmem %s1330_s18, 32 }
 0x59c   : > { %p1332_p8 = scmp.lt.s32.totalorder %s943_s19, %s1330_s18  ;;  %p1333_p9 = scmp.lt.s32.totalorder %s1331_s2, %s1325_s20 }
 0x59d   : > { %p1328_p7 = pneg %p1327_p6 }
 0x59e   : > { %p1334_p10 = por %p1333_p9, %p1332_p8 }
 0x5a0   : > { %p1335_p13 = pnand %p1334_p10, %p1328_p7 }
 0x5a2   : > { %1338 = shalt.err (!%p1335_p13)
}
 0x5a3   : > { %s1339_s26 = scalar_lea.hbm %s1752_s14, 16  ;;  %s1343_s24 = scalar_lea.hbm %s1801_s13, 128 }
 0x5a4   : > { %p1340_p0 = scmp.ne.s32.totalorder %s1752_s14, %s1339_s26  ;;  %p1344_p3 = scmp.lt.u32.totalorder %s1752_s14, %s1801_s13 }
 0x5a5   : > { %p1345_p4 = scmp.lt.u32.totalorder %s1343_s24, %s1339_s26  ;;  %p1347_p6 = scmp.lt.u32.totalorder %s1339_s26, %s1752_s14 }
 0x5a6   : > { %p1341_p1 = pnand %p1340_p0, %p1535_p11 }
 0x5a7   : > { %p1346_p5 = por %p1345_p4, %p1344_p3 }
 0x5a8   : > { %p1342_p2 = pneg %p1341_p1 }
 0x5a9   : > { %p1348_p7 = por %p1347_p6, %p1346_p5 }
 0x5ab   : > { %p1349_p8 = pnand %p1348_p7, %p1342_p2 }
 0x5ad   : > { %1352 = shalt.err (!%p1349_p8)
}
 0x5ae   : > { %1164 = dma.vmem_to_hbm [thread:$0]  (%p1535_p11), %s943_s19, 16, %s1752_s14, %s917_s16  }
 0x5af PF: > { %p1174_p9 = scmp.ge.s32.totalorder %s1393_s27, 2  ;;  %s954_s23 = sand.u32 1, %s1381_s3  }
 0x5b0   : > { %s955_s21 = scalar_lea.sflag [#allocation11], %s954_s23 }
 0x5b1   : > { %p1168_p10 = pnand %p1174_p9, %p1539_p12 }
 0x5b3   : > { %1372 = dma.done.wait (!%p1168_p10), %s955_s21, 16  }
 0x5b4   : > { %1374 = vsyncadd (!%p1168_p10), %s955_s21, 4294967280  ;;  %s963_s29 = scalar_lea.sflag [#allocation13], %s954_s23 }
 0x5b5   : > { %1376 = dma.done.wait (!%p1168_p10), %s963_s29, 16  }
 0x5b6   : > { %1378 = vsyncadd (!%p1168_p10), %s963_s29, 4294967280  ;;  %s1815_s3 = sld [smem:[#allocation17_spill]]  ;;  %s1816_s25 = sld [smem:[#allocation18_spill]] }
 0x5b7   : > { %s1817_s26 = sld [smem:[#allocation19_spill]]  ;;  %p45_p11 = scmp.ge.s32.totalorder %s1522_s30, 10  }
 0x5b8   : > { %s1818_s27 = smov %s1522_s30 }
 0x5b9   :  { %47 = sbr.rel (!%p45_p11) target bundleno = 51 (0x33), region = 159 }
 0x5c0   :  { %967 = vsyncpa [#allocation11], 1 }
 0x5c1   :  { %969 = vsyncpa [#allocation11 + $0x1], 1 }
 0x5c2   :  { %970 = vsyncpa [#allocation13], 1 }
 0x5c3   :  { %972 = vsyncpa [#allocation13 + $0x1], 1 }

</bundles_post_ra>
